<compile_context>
chip_gen: v7x
topology: tpu7x:2x2x1
jax: 0.10.0
libtpu: 0.0.40
codegen_flags: <defaults>
</compile_context>

<pallas_src>
import math

import jax
import jax.numpy as jnp
import numpy as np
from jax import lax
from jax.experimental import pallas as pl
from jax.experimental.pallas import tpu as pltpu

_LANES = 128
_SQRT2_INV = 1.0 / math.sqrt(2.0)


# ----------------------------- small math helpers -----------------------------
def _gelu(x):
    # exact (erf) GELU -- matches torch.nn.GELU() default (approximate='none')
    return 0.5 * x * (1.0 + lax.erf(x * _SQRT2_INV))


def _layernorm(x, g, b, eps=1e-5):
    mu = jnp.mean(x, axis=-1, keepdims=True)
    var = jnp.mean((x - mu) ** 2, axis=-1, keepdims=True)
    return (x - mu) * lax.rsqrt(var + eps) * g + b


def _round_up(n, m):
    return (n + m - 1) // m * m


# ------------------------------ parameter creation ------------------------------
def make_params(key, Tt, Dt, Tv, Dv):
    """Natural-layout synthetic parameters (Linear weights already (in, out))."""
    half, quarter = Dt // 2, Dt // 4
    ks = iter(jax.random.split(key, 64))

    def linear(fan_in, fan_out):
        w = jax.random.normal(next(ks), (fan_in, fan_out), jnp.float32) / math.sqrt(fan_in)
        b = jax.random.normal(next(ks), (fan_out,), jnp.float32) * 0.01
        return w, b

    def conv1(c_in, c_out):  # Conv1d(k=1): weight (out, in), bias (out,)
        w = jax.random.normal(next(ks), (c_out, c_in), jnp.float32) / math.sqrt(c_in)
        b = jax.random.normal(next(ks), (c_out,), jnp.float32) * 0.01
        return w, b

    def lnorm(d):
        return jnp.ones((d,), jnp.float32), jnp.zeros((d,), jnp.float32)

    p = {}
    # resampler ZipperBlock: tokens Tv->Tt (hidden 2*Tv), size Dv->Dt (hidden 2*Dv)
    p["rz1_w"], p["rz1_b"] = conv1(Tv, 2 * Tv)
    p["rz2_w"], p["rz2_b"] = conv1(2 * Tv, Tt)
    p["rln_g"], p["rln_b"] = lnorm(Dv)
    p["rf1_w"], p["rf1_b"] = linear(Dv, 2 * Dv)
    p["rf2_w"], p["rf2_b"] = linear(2 * Dv, Dt)
    # zipper block 0: tokens Tt->Tt (hidden 2*Tt), size 2*Dt->Dt (hidden 2*Dt)
    p["bz1_w"], p["bz1_b"] = conv1(Tt, 2 * Tt)
    p["bz2_w"], p["bz2_b"] = conv1(2 * Tt, Tt)
    p["bln_g"], p["bln_b"] = lnorm(2 * Dt)
    p["bf1_w"], p["bf1_b"] = linear(2 * Dt, 2 * Dt)
    p["bf2_w"], p["bf2_b"] = linear(2 * Dt, Dt)
    # contextual alpha mask
    p["a1_w"], p["a1_b"] = linear(Dt, Dt)
    p["a2_w"], p["a2_b"] = linear(Dt, half)
    p["an1_g"], p["an1_b"] = lnorm(half)
    p["a3_w"], p["a3_b"] = linear(half, half)
    p["a4_w"], p["a4_b"] = linear(half, quarter)
    p["an2_g"], p["an2_b"] = lnorm(quarter)
    p["a5_w"], p["a5_b"] = linear(quarter, quarter)
    p["a6_w"] = jax.random.normal(next(ks), (quarter,), jnp.float32) * 1e-4
    p["a6_b"] = jax.random.normal(next(ks), (), jnp.float32) * 0.01
    return p


# ------------------------------ parameter packing ------------------------------
def kernel_param_entries(p, Tt, Dt, Tv, Dv, B):
    """Re-layout natural params for the packed slab:
       - conv weights kept (out, in) as dot LHS; conv biases pre-broadcast over
         ALL folded lanes so in-kernel adds are pure VPU ops,
       - lane-sparse Linear weights stored TRANSPOSED (out, in) -> lane-dense
         at lane offset 0, contracted in-kernel with a trans_b dot_general,
       - every (1, D) bias / LN row left as a single row (co-packed later)."""
    row = lambda v: jnp.reshape(v, (1, -1))
    Lr = B * Dv        # folded lanes for resampler convs  (= 128 here)
    Lz = B * 2 * Dt    # folded lanes for zipper convs     (= 128 here)
    e = {}
    # --- matrices (each gets its own 8-row-aligned tile, lane offset 0) ---
    e["rz1_w"] = p["rz1_w"]                                            # (2Tv, Tv)
    e["rz1_b"] = jnp.broadcast_to(p["rz1_b"][:, None], (2 * Tv, Lr))
    e["rz2_w"] = p["rz2_w"]                                            # (Tt, 2Tv)
    e["rz2_b"] = jnp.broadcast_to(p["rz2_b"][:, None], (Tt, Lr))
    e["rf1_w"] = p["rf1_w"]                                            # (Dv, 2Dv) dense
    e["rf2_wt"] = p["rf2_w"].T                                         # (Dt, 2Dv) dense
    e["bz1_w"] = p["bz1_w"]                                            # (2Tt, Tt)
    e["bz1_b"] = jnp.broadcast_to(p["bz1_b"][:, None], (2 * Tt, Lz))
    e["bz2_w"] = p["bz2_w"]                                            # (Tt, 2Tt)
    e["bz2_b"] = jnp.broadcast_to(p["bz2_b"][:, None], (Tt, Lz))
    e["bf1_w"] = p["bf1_w"]                                            # (2Dt, 2Dt)
    e["bf2_wt"] = p["bf2_w"].T                                         # (Dt, 2Dt)
    e["a1_w"] = p["a1_w"]
    e["a2_wt"] = p["a2_w"].T
    e["a3_w"] = p["a3_w"]
    e["a4_wt"] = p["a4_w"].T
    e["a5_w"] = p["a5_w"]
    # --- (1, D) rows: co-packed 8 per tile by pack_params ---
    e["rln_g"], e["rln_b"] = row(p["rln_g"]), row(p["rln_b"])
    e["rf1_b"], e["rf2_b"] = row(p["rf1_b"]), row(p["rf2_b"])
    e["bln_g"], e["bln_b"] = row(p["bln_g"]), row(p["bln_b"])
    e["bf1_b"], e["bf2_b"] = row(p["bf1_b"]), row(p["bf2_b"])
    e["a1_b"], e["a2_b"] = row(p["a1_b"]), row(p["a2_b"])
    e["an1_g"], e["an1_b"] = row(p["an1_g"]), row(p["an1_b"])
    e["a3_b"], e["a4_b"] = row(p["a3_b"]), row(p["a4_b"])
    e["an2_g"], e["an2_b"] = row(p["an2_g"]), row(p["an2_b"])
    e["a5_b"] = row(p["a5_b"])
    e["a6_w"], e["a6_b"] = row(p["a6_w"]), jnp.reshape(p["a6_b"], (1, 1))
    return e


def pack_params(entries, lanes=_LANES):
    """Concatenate all parameter tensors into one (rows, 128) f32 slab.
       Matrices start at 8-row-aligned offsets (static aligned slices, MXU
       operands at lane offset 0).  (1, D) bias/LN rows are co-packed 8 per
       8x128 tile (one sublane each) to cut slab zero-padding -> one small DMA."""
    layout = {}
    pieces = []
    rows = 0
    row_entries = []
    for name, arr in entries.items():
        arr = jnp.asarray(arr, jnp.float32)
        if arr.shape[0] == 1:
            row_entries.append((name, arr))
            continue
        r, c = arr.shape
        rp = _round_up(r, 8)
        tile = jnp.zeros((rp, lanes), jnp.float32).at[:r, :c].set(arr)
        layout[name] = (rows, r, c)
        pieces.append(tile)
        rows += rp
    for i in range(0, len(row_entries), 8):
        group = row_entries[i:i + 8]
        tile = jnp.zeros((8, lanes), jnp.float32)
        for j, (name, arr) in enumerate(group):
            c = arr.shape[1]
            tile = tile.at[j, :c].set(arr[0])
            layout[name] = (rows + j, 1, c)
        pieces.append(tile)
        rows += 8
    return jnp.concatenate(pieces, axis=0), layout


# --------------------------------- the kernel ---------------------------------
def make_fusion_kernel(layout, B, Tt, Dt, Tv, Dv):
    f32 = jnp.float32

    def matmul(a, b):
        return jnp.dot(a, b, preferred_element_type=f32)

    def matmul_t(a, bt):
        # a @ bt.T with bt stored lane-dense as (out, in); contract last-last.
        return lax.dot_general(a, bt, (((1,), (1,)), ((), ())),
                               preferred_element_type=f32)

    def unfold(h, width):
        # (T, B*width) lane-folded -> (B*T, width) sublane-folded (row = b*T + t)
        return jnp.concatenate(
            [h[:, b * width:(b + 1) * width] for b in range(B)], axis=0)

    def kernel(text_ref, vision_ref, p_ref, out_ref):
        def g(name):  # static slice of the packed param slab
            off, r, c = layout[name]
            return p_ref[off:off + r, 0:c]

        text2 = text_ref[...]          # (B*Tt, Dt)   batch folded into sublanes
        vis_f = vision_ref[...]        # (Tv, B*Dv)   batch folded into lanes (128)

        # ------------- resampler ZipperBlock(vision) -------------
        # token convs: single lane-dense dots (one MXU weight push each)
        h = _gelu(matmul(g("rz1_w"), vis_f) + g("rz1_b"))        # (2Tv, B*Dv)
        h = matmul(g("rz2_w"), h) + g("rz2_b")                   # (Tt, B*Dv)
        h = unfold(h, Dv)                                        # (B*Tt, Dv)
        s = _layernorm(h, g("rln_g"), g("rln_b"))
        s = _gelu(matmul(s, g("rf1_w")) + g("rf1_b"))            # (B*Tt, 2Dv)
        x = matmul_t(s, g("rf2_wt")) + g("rf2_b")                # (B*Tt, Dt)

        # ------------- zipper block (num_blocks = 1) -------------
        res = x
        xc2 = jnp.concatenate([text2, x], axis=1)                # (B*Tt, 2Dt) = cat([text,x],-1)
        xc_f = jnp.concatenate(                                  # (Tt, B*2Dt) lane-folded
            [xc2[b * Tt:(b + 1) * Tt, :] for b in range(B)], axis=1)
        h = _gelu(matmul(g("bz1_w"), xc_f) + g("bz1_b"))         # (2Tt, B*2Dt)
        h = matmul(g("bz2_w"), h) + g("bz2_b")                   # (Tt, B*2Dt)
        h = unfold(h, 2 * Dt)                                    # (B*Tt, 2Dt)
        s = _layernorm(h, g("bln_g"), g("bln_b"))
        s = _gelu(matmul(s, g("bf1_w")) + g("bf1_b"))            # (B*Tt, 2Dt)
        x = matmul_t(s, g("bf2_wt")) + g("bf2_b") + res          # (B*Tt, Dt)

        # ------------- contextual alpha mask on text -------------
        a = _gelu(matmul(text2, g("a1_w")) + g("a1_b"))
        a = matmul_t(a, g("a2_wt")) + g("a2_b")
        a = _gelu(_layernorm(a, g("an1_g"), g("an1_b")))
        a = _gelu(matmul(a, g("a3_w")) + g("a3_b"))
        a = matmul_t(a, g("a4_wt")) + g("a4_b")
        a = _gelu(_layernorm(a, g("an2_g"), g("an2_b")))
        a = _gelu(matmul(a, g("a5_w")) + g("a5_b"))
        # fc6: out_features == 1 -> lane reduction instead of an N=1 matmul
        logit = jnp.sum(a * g("a6_w"), axis=-1, keepdims=True) + g("a6_b")
        alpha = jax.nn.sigmoid(logit)                            # (B*Tt, 1)

        out_ref[...] = alpha * x + (1.0 - alpha) * text2         # (B*Tt, Dt)

    return kernel


# ------------------------------ wrapper / cost hint ------------------------------
def _cost_estimate(B, Tt, Dt, Tv, Dv, slab_rows):
    Lr, Lz = B * Dv, B * 2 * Dt
    N, half, quarter = B * Tt, Dt // 2, Dt // 4
    mnk = [
        (2 * Tv, Lr, Tv), (Tt, Lr, 2 * Tv),          # resampler token convs (folded)
        (N, 2 * Dv, Dv), (N, Dt, 2 * Dv),            # resampler hidden linears
        (2 * Tt, Lz, Tt), (Tt, Lz, 2 * Tt),          # zipper token convs (folded)
        (N, 2 * Dt, 2 * Dt), (N, Dt, 2 * Dt),        # zipper hidden linears
        (N, Dt, Dt), (N, half, Dt), (N, half, half),
        (N, quarter, half), (N, quarter, quarter),
    ]
    flops = 2 * sum(m * n * k for m, n, k in mnk) + 2 * N * quarter
    gelu_elems = (2 * Tv * Lr + N * 2 * Dv + 2 * Tt * Lz + N * 2 * Dt
                  + N * (Dt + 2 * half + 2 * quarter))
    bytes_accessed = 4 * (2 * N * Dt + Tv * Lr + slab_rows * _LANES)
    return pl.CostEstimate(flops=flops, transcendentals=gelu_elems + N,
                           bytes_accessed=bytes_accessed)


def fusion_forward(text_embeds, vision_embeds, slab, layout):
    B, Tt, Dt = text_embeds.shape
    _, Tv, Dv = vision_embeds.shape
    # Wrapper-side layout plumbing (pure relayout, no compute hoisting):
    #   text  -> (B*Tt, Dt)  : batch folded into sublanes (alpha mask / blend layout)
    #   vision-> (Tv, B*Dv)  : batch folded into lanes -> fully lane-dense conv DMA
    text2 = text_embeds.reshape(B * Tt, Dt)
    vision_f = jnp.transpose(vision_embeds, (1, 0, 2)).reshape(Tv, B * Dv)
    kernel = make_fusion_kernel(layout, B, Tt, Dt, Tv, Dv)
    # No grid: single invocation, everything resident in VMEM (~0.3 MiB total,
    # far under the scoped VMEM limit on v5e/v6e/v7x -- tiling would only add
    # per-step overhead).
    out2 = pl.pallas_call(
        kernel,
        out_shape=jax.ShapeDtypeStruct((B * Tt, Dt), jnp.float32),
        in_specs=[pl.BlockSpec(memory_space=pltpu.MemorySpace.VMEM)] * 3,
        out_specs=pl.BlockSpec(memory_space=pltpu.MemorySpace.VMEM),
        cost_estimate=_cost_estimate(B, Tt, Dt, Tv, Dv, slab.shape[0]),
    )(text2, vision_f, slab)
    return out2.reshape(B, Tt, Dt)


# ----------------------------- plain-JAX reference -----------------------------
def reference_forward(text, vision, p):
    h = jnp.einsum("oc,bcl->bol", p["rz1_w"], vision) + p["rz1_b"][None, :, None]
    h = _gelu(h)
    h = jnp.einsum("oc,bcl->bol", p["rz2_w"], h) + p["rz2_b"][None, :, None]
    s = _layernorm(h, p["rln_g"], p["rln_b"])
    s = _gelu(s @ p["rf1_w"] + p["rf1_b"])
    x = s @ p["rf2_w"] + p["rf2_b"]

    res = x
    xc = jnp.concatenate([text, x], axis=-1)
    h = jnp.einsum("oc,bcl->bol", p["bz1_w"], xc) + p["bz1_b"][None, :, None]
    h = _gelu(h)
    h = jnp.einsum("oc,bcl->bol", p["bz2_w"], h) + p["bz2_b"][None, :, None]
    s = _layernorm(h, p["bln_g"], p["bln_b"])
    s = _gelu(s @ p["bf1_w"] + p["bf1_b"])
    x = (s @ p["bf2_w"] + p["bf2_b"]) + res

    a = _gelu(text @ p["a1_w"] + p["a1_b"])
    a = a @ p["a2_w"] + p["a2_b"]
    a = _gelu(_layernorm(a, p["an1_g"], p["an1_b"]))
    a = _gelu(a @ p["a3_w"] + p["a3_b"])
    a = a @ p["a4_w"] + p["a4_b"]
    a = _gelu(_layernorm(a, p["an2_g"], p["an2_b"]))
    a = _gelu(a @ p["a5_w"] + p["a5_b"])
    alpha = jax.nn.sigmoid(a @ p["a6_w"][:, None] + p["a6_b"])
    return alpha * x + (1.0 - alpha) * text


# ------------------------------------ main ------------------------------------
if __name__ == "__main__":
    # Small shapes consistent with the module:
    #   text:   (B, text_tokens, text_hidden)     = (2, 8, 32)
    #   vision: (B, vision_tokens, vision_hidden) = (2, 16, 64)
    # (note B*Dv = B*2*Dt = 128 -> the folded conv layouts are exactly lane-dense)
    B, Tt, Dt, Tv, Dv = 2, 8, 32, 16, 64

    key = jax.random.PRNGKey(0)
    k_text, k_vis, k_params = jax.random.split(key, 3)
    text_embeds = jax.random.normal(k_text, (B, Tt, Dt), jnp.float32)
    vision_embeds = jax.random.normal(k_vis, (B, Tv, Dv), jnp.float32)

    params = make_params(k_params, Tt, Dt, Tv, Dv)
    slab, layout = pack_params(kernel_param_entries(params, Tt, Dt, Tv, Dv, B))

    out = fusion_forward(text_embeds, vision_embeds, slab, layout)
    out = jax.block_until_ready(out)

    ref = reference_forward(text_embeds, vision_embeds, params)
    np.testing.assert_allclose(np.asarray(out), np.asarray(ref), rtol=1e-3, atol=1e-3)

    print("KERNEL_OK")
</pallas_src>

<mosaic_0001>
module attributes {stable_mosaic.version = 11 : i64} {
  func.func @kernel(%arg0: memref<16x32xf32, #tpu.memory_space<vmem>>, %arg1: memref<16x128xf32, #tpu.memory_space<vmem>>, %arg2: memref<424x128xf32, #tpu.memory_space<vmem>>, %arg3: memref<16x32xf32, #tpu.memory_space<vmem>>) attributes {dimension_semantics = [], scalar_prefetch = 0 : i64, scratch_operands = 0 : i64, tpu.core_type = #tpu.core_type<tc>} {
    %c0 = arith.constant 0 : index
    %c0_0 = arith.constant 0 : index
    %0 = vector.load %arg0[%c0, %c0_0] : memref<16x32xf32, #tpu.memory_space<vmem>>, vector<16x32xf32>
    %c0_1 = arith.constant 0 : index
    %c0_2 = arith.constant 0 : index
    %1 = vector.load %arg1[%c0_1, %c0_2] : memref<16x128xf32, #tpu.memory_space<vmem>>, vector<16x128xf32>
    %c0_3 = arith.constant 0 : index
    %c0_4 = arith.constant 0 : index
    %2 = vector.load %arg2[%c0_3, %c0_4] : memref<424x128xf32, #tpu.memory_space<vmem>>, vector<32x16xf32>
    %cst = arith.constant dense<0.000000e+00> : vector<32x128xf32>
    %3 = tpu.matmul %2, %1, %cst {dimension_numbers = #tpu.dot_dimension_numbers<[1], [0], [0], [1], [0, 0, 1, 1], [], []>} : vector<32x16xf32>, vector<16x128xf32>, vector<32x128xf32> -> vector<32x128xf32>
    %c32 = arith.constant 32 : index
    %c0_5 = arith.constant 0 : index
    %4 = vector.load %arg2[%c32, %c0_5] : memref<424x128xf32, #tpu.memory_space<vmem>>, vector<32x128xf32>
    %5 = arith.addf %3, %4 : vector<32x128xf32>
    %cst_6 = arith.constant 5.000000e-01 : f32
    %6 = vector.broadcast %cst_6 : f32 to vector<32x128xf32>
    %7 = arith.mulf %6, %5 : vector<32x128xf32>
    %cst_7 = arith.constant 0.707106769 : f32
    %8 = vector.broadcast %cst_7 : f32 to vector<32x128xf32>
    %9 = arith.mulf %5, %8 : vector<32x128xf32>
    %10 = math.erf %9 : vector<32x128xf32>
    %cst_8 = arith.constant 1.000000e+00 : f32
    %11 = vector.broadcast %cst_8 : f32 to vector<32x128xf32>
    %12 = arith.addf %11, %10 : vector<32x128xf32>
    %13 = arith.mulf %7, %12 : vector<32x128xf32>
    %c64 = arith.constant 64 : index
    %c0_9 = arith.constant 0 : index
    %14 = vector.load %arg2[%c64, %c0_9] : memref<424x128xf32, #tpu.memory_space<vmem>>, vector<8x32xf32>
    %cst_10 = arith.constant dense<0.000000e+00> : vector<8x128xf32>
    %15 = tpu.matmul %14, %13, %cst_10 {dimension_numbers = #tpu.dot_dimension_numbers<[1], [0], [0], [1], [0, 0, 1, 1], [], []>} : vector<8x32xf32>, vector<32x128xf32>, vector<8x128xf32> -> vector<8x128xf32>
    %c72 = arith.constant 72 : index
    %c0_11 = arith.constant 0 : index
    %16 = vector.load %arg2[%c72, %c0_11] : memref<424x128xf32, #tpu.memory_space<vmem>>, vector<8x128xf32>
    %17 = arith.addf %15, %16 : vector<8x128xf32>
    %18 = vector.extract_strided_slice %17 {offsets = [0, 0], sizes = [8, 64], strides = [1, 1]} : vector<8x128xf32> to vector<8x64xf32>
    %19 = vector.extract_strided_slice %17 {offsets = [0, 64], sizes = [8, 64], strides = [1, 1]} : vector<8x128xf32> to vector<8x64xf32>
    %20 = tpu.concatenate %18, %19 in 0 : vector<8x64xf32>, vector<8x64xf32> -> vector<16x64xf32>
    %c400 = arith.constant 400 : index
    %c0_12 = arith.constant 0 : index
    %21 = vector.load %arg2[%c400, %c0_12] : memref<424x128xf32, #tpu.memory_space<vmem>>, vector<1x64xf32>
    %c401 = arith.constant 401 : index
    %c0_13 = arith.constant 0 : index
    %22 = vector.load %arg2[%c401, %c0_13] : memref<424x128xf32, #tpu.memory_space<vmem>>, vector<1x64xf32>
    %cst_14 = arith.constant dense<0.000000e+00> : vector<16xf32>
    %23 = vector.multi_reduction <add>, %20, %cst_14 [1] : vector<16x64xf32> to vector<16xf32>
    %24 = vector.shape_cast %23 : vector<16xf32> to vector<16x1xf32>
    %cst_15 = arith.constant 6.400000e+01 : f32
    %25 = vector.broadcast %cst_15 : f32 to vector<16x1xf32>
    %26 = arith.divf %24, %25 : vector<16x1xf32>
    %27 = vector.broadcast %26 : vector<16x1xf32> to vector<16x64xf32>
    %28 = arith.subf %20, %27 : vector<16x64xf32>
    %29 = arith.mulf %28, %28 : vector<16x64xf32>
    %cst_16 = arith.constant dense<0.000000e+00> : vector<16xf32>
    %30 = vector.multi_reduction <add>, %29, %cst_16 [1] : vector<16x64xf32> to vector<16xf32>
    %31 = vector.shape_cast %30 : vector<16xf32> to vector<16x1xf32>
    %cst_17 = arith.constant 6.400000e+01 : f32
    %32 = vector.broadcast %cst_17 : f32 to vector<16x1xf32>
    %33 = arith.divf %31, %32 : vector<16x1xf32>
    %34 = vector.broadcast %26 : vector<16x1xf32> to vector<16x64xf32>
    %35 = arith.subf %20, %34 : vector<16x64xf32>
    %cst_18 = arith.constant 9.99999974E-6 : f32
    %36 = vector.broadcast %cst_18 : f32 to vector<16x1xf32>
    %37 = arith.addf %33, %36 : vector<16x1xf32>
    %38 = math.rsqrt %37 : vector<16x1xf32>
    %39 = vector.broadcast %38 : vector<16x1xf32> to vector<16x64xf32>
    %40 = arith.mulf %35, %39 : vector<16x64xf32>
    %41 = vector.broadcast %21 : vector<1x64xf32> to vector<16x64xf32>
    %42 = arith.mulf %40, %41 : vector<16x64xf32>
    %43 = vector.broadcast %22 : vector<1x64xf32> to vector<16x64xf32>
    %44 = arith.addf %42, %43 : vector<16x64xf32>
    %c80 = arith.constant 80 : index
    %c0_19 = arith.constant 0 : index
    %45 = vector.load %arg2[%c80, %c0_19] : memref<424x128xf32, #tpu.memory_space<vmem>>, vector<64x128xf32>
    %cst_20 = arith.constant dense<0.000000e+00> : vector<16x128xf32>
    %46 = tpu.matmul %44, %45, %cst_20 {dimension_numbers = #tpu.dot_dimension_numbers<[1], [0], [0], [1], [0, 0, 1, 1], [], []>} : vector<16x64xf32>, vector<64x128xf32>, vector<16x128xf32> -> vector<16x128xf32>
    %c402 = arith.constant 402 : index
    %c0_21 = arith.constant 0 : index
    %47 = vector.load %arg2[%c402, %c0_21] : memref<424x128xf32, #tpu.memory_space<vmem>>, vector<1x128xf32>
    %48 = vector.broadcast %47 : vector<1x128xf32> to vector<16x128xf32>
    %49 = arith.addf %46, %48 : vector<16x128xf32>
    %cst_22 = arith.constant 5.000000e-01 : f32
    %50 = vector.broadcast %cst_22 : f32 to vector<16x128xf32>
    %51 = arith.mulf %50, %49 : vector<16x128xf32>
    %cst_23 = arith.constant 0.707106769 : f32
    %52 = vector.broadcast %cst_23 : f32 to vector<16x128xf32>
    %53 = arith.mulf %49, %52 : vector<16x128xf32>
    %54 = math.erf %53 : vector<16x128xf32>
    %cst_24 = arith.constant 1.000000e+00 : f32
    %55 = vector.broadcast %cst_24 : f32 to vector<16x128xf32>
    %56 = arith.addf %55, %54 : vector<16x128xf32>
    %57 = arith.mulf %51, %56 : vector<16x128xf32>
    %c144 = arith.constant 144 : index
    %c0_25 = arith.constant 0 : index
    %58 = vector.load %arg2[%c144, %c0_25] : memref<424x128xf32, #tpu.memory_space<vmem>>, vector<32x128xf32>
    %cst_26 = arith.constant dense<0.000000e+00> : vector<16x32xf32>
    %59 = tpu.matmul %57, %58, %cst_26 {dimension_numbers = #tpu.dot_dimension_numbers<[1], [1], [0], [0], [0, 0, 1, 0], [], []>} : vector<16x128xf32>, vector<32x128xf32>, vector<16x32xf32> -> vector<16x32xf32>
    %c403 = arith.constant 403 : index
    %c0_27 = arith.constant 0 : index
    %60 = vector.load %arg2[%c403, %c0_27] : memref<424x128xf32, #tpu.memory_space<vmem>>, vector<1x32xf32>
    %61 = vector.broadcast %60 : vector<1x32xf32> to vector<16x32xf32>
    %62 = arith.addf %59, %61 : vector<16x32xf32>
    %63 = tpu.concatenate %0, %62 in 1 : vector<16x32xf32>, vector<16x32xf32> -> vector<16x64xf32>
    %64 = vector.extract_strided_slice %63 {offsets = [0, 0], sizes = [8, 64], strides = [1, 1]} : vector<16x64xf32> to vector<8x64xf32>
    %65 = vector.extract_strided_slice %63 {offsets = [8, 0], sizes = [8, 64], strides = [1, 1]} : vector<16x64xf32> to vector<8x64xf32>
    %66 = tpu.concatenate %64, %65 in 1 : vector<8x64xf32>, vector<8x64xf32> -> vector<8x128xf32>
    %c176 = arith.constant 176 : index
    %c0_28 = arith.constant 0 : index
    %67 = vector.load %arg2[%c176, %c0_28] : memref<424x128xf32, #tpu.memory_space<vmem>>, vector<16x8xf32>
    %cst_29 = arith.constant dense<0.000000e+00> : vector<16x128xf32>
    %68 = tpu.matmul %67, %66, %cst_29 {dimension_numbers = #tpu.dot_dimension_numbers<[1], [0], [0], [1], [0, 0, 1, 1], [], []>} : vector<16x8xf32>, vector<8x128xf32>, vector<16x128xf32> -> vector<16x128xf32>
    %c192 = arith.constant 192 : index
    %c0_30 = arith.constant 0 : index
    %69 = vector.load %arg2[%c192, %c0_30] : memref<424x128xf32, #tpu.memory_space<vmem>>, vector<16x128xf32>
    %70 = arith.addf %68, %69 : vector<16x128xf32>
    %cst_31 = arith.constant 5.000000e-01 : f32
    %71 = vector.broadcast %cst_31 : f32 to vector<16x128xf32>
    %72 = arith.mulf %71, %70 : vector<16x128xf32>
    %cst_32 = arith.constant 0.707106769 : f32
    %73 = vector.broadcast %cst_32 : f32 to vector<16x128xf32>
    %74 = arith.mulf %70, %73 : vector<16x128xf32>
    %75 = math.erf %74 : vector<16x128xf32>
    %cst_33 = arith.constant 1.000000e+00 : f32
    %76 = vector.broadcast %cst_33 : f32 to vector<16x128xf32>
    %77 = arith.addf %76, %75 : vector<16x128xf32>
    %78 = arith.mulf %72, %77 : vector<16x128xf32>
    %c208 = arith.constant 208 : index
    %c0_34 = arith.constant 0 : index
    %79 = vector.load %arg2[%c208, %c0_34] : memref<424x128xf32, #tpu.memory_space<vmem>>, vector<8x16xf32>
    %cst_35 = arith.constant dense<0.000000e+00> : vector<8x128xf32>
    %80 = tpu.matmul %79, %78, %cst_35 {dimension_numbers = #tpu.dot_dimension_numbers<[1], [0], [0], [1], [0, 0, 1, 1], [], []>} : vector<8x16xf32>, vector<16x128xf32>, vector<8x128xf32> -> vector<8x128xf32>
    %c216 = arith.constant 216 : index
    %c0_36 = arith.constant 0 : index
    %81 = vector.load %arg2[%c216, %c0_36] : memref<424x128xf32, #tpu.memory_space<vmem>>, vector<8x128xf32>
    %82 = arith.addf %80, %81 : vector<8x128xf32>
    %83 = vector.extract_strided_slice %82 {offsets = [0, 0], sizes = [8, 64], strides = [1, 1]} : vector<8x128xf32> to vector<8x64xf32>
    %84 = vector.extract_strided_slice %82 {offsets = [0, 64], sizes = [8, 64], strides = [1, 1]} : vector<8x128xf32> to vector<8x64xf32>
    %85 = tpu.concatenate %83, %84 in 0 : vector<8x64xf32>, vector<8x64xf32> -> vector<16x64xf32>
    %c404 = arith.constant 404 : index
    %c0_37 = arith.constant 0 : index
    %86 = vector.load %arg2[%c404, %c0_37] : memref<424x128xf32, #tpu.memory_space<vmem>>, vector<1x64xf32>
    %c405 = arith.constant 405 : index
    %c0_38 = arith.constant 0 : index
    %87 = vector.load %arg2[%c405, %c0_38] : memref<424x128xf32, #tpu.memory_space<vmem>>, vector<1x64xf32>
    %cst_39 = arith.constant dense<0.000000e+00> : vector<16xf32>
    %88 = vector.multi_reduction <add>, %85, %cst_39 [1] : vector<16x64xf32> to vector<16xf32>
    %89 = vector.shape_cast %88 : vector<16xf32> to vector<16x1xf32>
    %cst_40 = arith.constant 6.400000e+01 : f32
    %90 = vector.broadcast %cst_40 : f32 to vector<16x1xf32>
    %91 = arith.divf %89, %90 : vector<16x1xf32>
    %92 = vector.broadcast %91 : vector<16x1xf32> to vector<16x64xf32>
    %93 = arith.subf %85, %92 : vector<16x64xf32>
    %94 = arith.mulf %93, %93 : vector<16x64xf32>
    %cst_41 = arith.constant dense<0.000000e+00> : vector<16xf32>
    %95 = vector.multi_reduction <add>, %94, %cst_41 [1] : vector<16x64xf32> to vector<16xf32>
    %96 = vector.shape_cast %95 : vector<16xf32> to vector<16x1xf32>
    %cst_42 = arith.constant 6.400000e+01 : f32
    %97 = vector.broadcast %cst_42 : f32 to vector<16x1xf32>
    %98 = arith.divf %96, %97 : vector<16x1xf32>
    %99 = vector.broadcast %91 : vector<16x1xf32> to vector<16x64xf32>
    %100 = arith.subf %85, %99 : vector<16x64xf32>
    %cst_43 = arith.constant 9.99999974E-6 : f32
    %101 = vector.broadcast %cst_43 : f32 to vector<16x1xf32>
    %102 = arith.addf %98, %101 : vector<16x1xf32>
    %103 = math.rsqrt %102 : vector<16x1xf32>
    %104 = vector.broadcast %103 : vector<16x1xf32> to vector<16x64xf32>
    %105 = arith.mulf %100, %104 : vector<16x64xf32>
    %106 = vector.broadcast %86 : vector<1x64xf32> to vector<16x64xf32>
    %107 = arith.mulf %105, %106 : vector<16x64xf32>
    %108 = vector.broadcast %87 : vector<1x64xf32> to vector<16x64xf32>
    %109 = arith.addf %107, %108 : vector<16x64xf32>
    %c224 = arith.constant 224 : index
    %c0_44 = arith.constant 0 : index
    %110 = vector.load %arg2[%c224, %c0_44] : memref<424x128xf32, #tpu.memory_space<vmem>>, vector<64x64xf32>
    %cst_45 = arith.constant dense<0.000000e+00> : vector<16x64xf32>
    %111 = tpu.matmul %109, %110, %cst_45 {dimension_numbers = #tpu.dot_dimension_numbers<[1], [0], [0], [1], [0, 0, 1, 1], [], []>} : vector<16x64xf32>, vector<64x64xf32>, vector<16x64xf32> -> vector<16x64xf32>
    %c406 = arith.constant 406 : index
    %c0_46 = arith.constant 0 : index
    %112 = vector.load %arg2[%c406, %c0_46] : memref<424x128xf32, #tpu.memory_space<vmem>>, vector<1x64xf32>
    %113 = vector.broadcast %112 : vector<1x64xf32> to vector<16x64xf32>
    %114 = arith.addf %111, %113 : vector<16x64xf32>
    %cst_47 = arith.constant 5.000000e-01 : f32
    %115 = vector.broadcast %cst_47 : f32 to vector<16x64xf32>
    %116 = arith.mulf %115, %114 : vector<16x64xf32>
    %cst_48 = arith.constant 0.707106769 : f32
    %117 = vector.broadcast %cst_48 : f32 to vector<16x64xf32>
    %118 = arith.mulf %114, %117 : vector<16x64xf32>
    %119 = math.erf %118 : vector<16x64xf32>
    %cst_49 = arith.constant 1.000000e+00 : f32
    %120 = vector.broadcast %cst_49 : f32 to vector<16x64xf32>
    %121 = arith.addf %120, %119 : vector<16x64xf32>
    %122 = arith.mulf %116, %121 : vector<16x64xf32>
    %c288 = arith.constant 288 : index
    %c0_50 = arith.constant 0 : index
    %123 = vector.load %arg2[%c288, %c0_50] : memref<424x128xf32, #tpu.memory_space<vmem>>, vector<32x64xf32>
    %cst_51 = arith.constant dense<0.000000e+00> : vector<16x32xf32>
    %124 = tpu.matmul %122, %123, %cst_51 {dimension_numbers = #tpu.dot_dimension_numbers<[1], [1], [0], [0], [0, 0, 1, 0], [], []>} : vector<16x64xf32>, vector<32x64xf32>, vector<16x32xf32> -> vector<16x32xf32>
    %c407 = arith.constant 407 : index
    %c0_52 = arith.constant 0 : index
    %125 = vector.load %arg2[%c407, %c0_52] : memref<424x128xf32, #tpu.memory_space<vmem>>, vector<1x32xf32>
    %126 = vector.broadcast %125 : vector<1x32xf32> to vector<16x32xf32>
    %127 = arith.addf %124, %126 : vector<16x32xf32>
    %128 = arith.addf %127, %62 : vector<16x32xf32>
    %c320 = arith.constant 320 : index
    %c0_53 = arith.constant 0 : index
    %129 = vector.load %arg2[%c320, %c0_53] : memref<424x128xf32, #tpu.memory_space<vmem>>, vector<32x32xf32>
    %cst_54 = arith.constant dense<0.000000e+00> : vector<16x32xf32>
    %130 = tpu.matmul %0, %129, %cst_54 {dimension_numbers = #tpu.dot_dimension_numbers<[1], [0], [0], [1], [0, 0, 1, 1], [], []>} : vector<16x32xf32>, vector<32x32xf32>, vector<16x32xf32> -> vector<16x32xf32>
    %c408 = arith.constant 408 : index
    %c0_55 = arith.constant 0 : index
    %131 = vector.load %arg2[%c408, %c0_55] : memref<424x128xf32, #tpu.memory_space<vmem>>, vector<1x32xf32>
    %132 = vector.broadcast %131 : vector<1x32xf32> to vector<16x32xf32>
    %133 = arith.addf %130, %132 : vector<16x32xf32>
    %cst_56 = arith.constant 5.000000e-01 : f32
    %134 = vector.broadcast %cst_56 : f32 to vector<16x32xf32>
    %135 = arith.mulf %134, %133 : vector<16x32xf32>
    %cst_57 = arith.constant 0.707106769 : f32
    %136 = vector.broadcast %cst_57 : f32 to vector<16x32xf32>
    %137 = arith.mulf %133, %136 : vector<16x32xf32>
    %138 = math.erf %137 : vector<16x32xf32>
    %cst_58 = arith.constant 1.000000e+00 : f32
    %139 = vector.broadcast %cst_58 : f32 to vector<16x32xf32>
    %140 = arith.addf %139, %138 : vector<16x32xf32>
    %141 = arith.mulf %135, %140 : vector<16x32xf32>
    %c352 = arith.constant 352 : index
    %c0_59 = arith.constant 0 : index
    %142 = vector.load %arg2[%c352, %c0_59] : memref<424x128xf32, #tpu.memory_space<vmem>>, vector<16x32xf32>
    %cst_60 = arith.constant dense<0.000000e+00> : vector<16x16xf32>
    %143 = tpu.matmul %141, %142, %cst_60 {dimension_numbers = #tpu.dot_dimension_numbers<[1], [1], [0], [0], [0, 0, 1, 0], [], []>} : vector<16x32xf32>, vector<16x32xf32>, vector<16x16xf32> -> vector<16x16xf32>
    %c409 = arith.constant 409 : index
    %c0_61 = arith.constant 0 : index
    %144 = vector.load %arg2[%c409, %c0_61] : memref<424x128xf32, #tpu.memory_space<vmem>>, vector<1x16xf32>
    %145 = vector.broadcast %144 : vector<1x16xf32> to vector<16x16xf32>
    %146 = arith.addf %143, %145 : vector<16x16xf32>
    %c410 = arith.constant 410 : index
    %c0_62 = arith.constant 0 : index
    %147 = vector.load %arg2[%c410, %c0_62] : memref<424x128xf32, #tpu.memory_space<vmem>>, vector<1x16xf32>
    %c411 = arith.constant 411 : index
    %c0_63 = arith.constant 0 : index
    %148 = vector.load %arg2[%c411, %c0_63] : memref<424x128xf32, #tpu.memory_space<vmem>>, vector<1x16xf32>
    %cst_64 = arith.constant dense<0.000000e+00> : vector<16xf32>
    %149 = vector.multi_reduction <add>, %146, %cst_64 [1] : vector<16x16xf32> to vector<16xf32>
    %150 = vector.shape_cast %149 : vector<16xf32> to vector<16x1xf32>
    %cst_65 = arith.constant 1.600000e+01 : f32
    %151 = vector.broadcast %cst_65 : f32 to vector<16x1xf32>
    %152 = arith.divf %150, %151 : vector<16x1xf32>
    %153 = vector.broadcast %152 : vector<16x1xf32> to vector<16x16xf32>
    %154 = arith.subf %146, %153 : vector<16x16xf32>
    %155 = arith.mulf %154, %154 : vector<16x16xf32>
    %cst_66 = arith.constant dense<0.000000e+00> : vector<16xf32>
    %156 = vector.multi_reduction <add>, %155, %cst_66 [1] : vector<16x16xf32> to vector<16xf32>
    %157 = vector.shape_cast %156 : vector<16xf32> to vector<16x1xf32>
    %cst_67 = arith.constant 1.600000e+01 : f32
    %158 = vector.broadcast %cst_67 : f32 to vector<16x1xf32>
    %159 = arith.divf %157, %158 : vector<16x1xf32>
    %160 = vector.broadcast %152 : vector<16x1xf32> to vector<16x16xf32>
    %161 = arith.subf %146, %160 : vector<16x16xf32>
    %cst_68 = arith.constant 9.99999974E-6 : f32
    %162 = vector.broadcast %cst_68 : f32 to vector<16x1xf32>
    %163 = arith.addf %159, %162 : vector<16x1xf32>
    %164 = math.rsqrt %163 : vector<16x1xf32>
    %165 = vector.broadcast %164 : vector<16x1xf32> to vector<16x16xf32>
    %166 = arith.mulf %161, %165 : vector<16x16xf32>
    %167 = vector.broadcast %147 : vector<1x16xf32> to vector<16x16xf32>
    %168 = arith.mulf %166, %167 : vector<16x16xf32>
    %169 = vector.broadcast %148 : vector<1x16xf32> to vector<16x16xf32>
    %170 = arith.addf %168, %169 : vector<16x16xf32>
    %cst_69 = arith.constant 5.000000e-01 : f32
    %171 = vector.broadcast %cst_69 : f32 to vector<16x16xf32>
    %172 = arith.mulf %171, %170 : vector<16x16xf32>
    %cst_70 = arith.constant 0.707106769 : f32
    %173 = vector.broadcast %cst_70 : f32 to vector<16x16xf32>
    %174 = arith.mulf %170, %173 : vector<16x16xf32>
    %175 = math.erf %174 : vector<16x16xf32>
    %cst_71 = arith.constant 1.000000e+00 : f32
    %176 = vector.broadcast %cst_71 : f32 to vector<16x16xf32>
    %177 = arith.addf %176, %175 : vector<16x16xf32>
    %178 = arith.mulf %172, %177 : vector<16x16xf32>
    %c368 = arith.constant 368 : index
    %c0_72 = arith.constant 0 : index
    %179 = vector.load %arg2[%c368, %c0_72] : memref<424x128xf32, #tpu.memory_space<vmem>>, vector<16x16xf32>
    %cst_73 = arith.constant dense<0.000000e+00> : vector<16x16xf32>
    %180 = tpu.matmul %178, %179, %cst_73 {dimension_numbers = #tpu.dot_dimension_numbers<[1], [0], [0], [1], [0, 0, 1, 1], [], []>} : vector<16x16xf32>, vector<16x16xf32>, vector<16x16xf32> -> vector<16x16xf32>
    %c412 = arith.constant 412 : index
    %c0_74 = arith.constant 0 : index
    %181 = vector.load %arg2[%c412, %c0_74] : memref<424x128xf32, #tpu.memory_space<vmem>>, vector<1x16xf32>
    %182 = vector.broadcast %181 : vector<1x16xf32> to vector<16x16xf32>
    %183 = arith.addf %180, %182 : vector<16x16xf32>
    %cst_75 = arith.constant 5.000000e-01 : f32
    %184 = vector.broadcast %cst_75 : f32 to vector<16x16xf32>
    %185 = arith.mulf %184, %183 : vector<16x16xf32>
    %cst_76 = arith.constant 0.707106769 : f32
    %186 = vector.broadcast %cst_76 : f32 to vector<16x16xf32>
    %187 = arith.mulf %183, %186 : vector<16x16xf32>
    %188 = math.erf %187 : vector<16x16xf32>
    %cst_77 = arith.constant 1.000000e+00 : f32
    %189 = vector.broadcast %cst_77 : f32 to vector<16x16xf32>
    %190 = arith.addf %189, %188 : vector<16x16xf32>
    %191 = arith.mulf %185, %190 : vector<16x16xf32>
    %c384 = arith.constant 384 : index
    %c0_78 = arith.constant 0 : index
    %192 = vector.load %arg2[%c384, %c0_78] : memref<424x128xf32, #tpu.memory_space<vmem>>, vector<8x16xf32>
    %cst_79 = arith.constant dense<0.000000e+00> : vector<16x8xf32>
    %193 = tpu.matmul %191, %192, %cst_79 {dimension_numbers = #tpu.dot_dimension_numbers<[1], [1], [0], [0], [0, 0, 1, 0], [], []>} : vector<16x16xf32>, vector<8x16xf32>, vector<16x8xf32> -> vector<16x8xf32>
    %c413 = arith.constant 413 : index
    %c0_80 = arith.constant 0 : index
    %194 = vector.load %arg2[%c413, %c0_80] : memref<424x128xf32, #tpu.memory_space<vmem>>, vector<1x8xf32>
    %195 = vector.broadcast %194 : vector<1x8xf32> to vector<16x8xf32>
    %196 = arith.addf %193, %195 : vector<16x8xf32>
    %c414 = arith.constant 414 : index
    %c0_81 = arith.constant 0 : index
    %197 = vector.load %arg2[%c414, %c0_81] : memref<424x128xf32, #tpu.memory_space<vmem>>, vector<1x8xf32>
    %c415 = arith.constant 415 : index
    %c0_82 = arith.constant 0 : index
    %198 = vector.load %arg2[%c415, %c0_82] : memref<424x128xf32, #tpu.memory_space<vmem>>, vector<1x8xf32>
    %cst_83 = arith.constant dense<0.000000e+00> : vector<16xf32>
    %199 = vector.multi_reduction <add>, %196, %cst_83 [1] : vector<16x8xf32> to vector<16xf32>
    %200 = vector.shape_cast %199 : vector<16xf32> to vector<16x1xf32>
    %cst_84 = arith.constant 8.000000e+00 : f32
    %201 = vector.broadcast %cst_84 : f32 to vector<16x1xf32>
    %202 = arith.divf %200, %201 : vector<16x1xf32>
    %203 = vector.broadcast %202 : vector<16x1xf32> to vector<16x8xf32>
    %204 = arith.subf %196, %203 : vector<16x8xf32>
    %205 = arith.mulf %204, %204 : vector<16x8xf32>
    %cst_85 = arith.constant dense<0.000000e+00> : vector<16xf32>
    %206 = vector.multi_reduction <add>, %205, %cst_85 [1] : vector<16x8xf32> to vector<16xf32>
    %207 = vector.shape_cast %206 : vector<16xf32> to vector<16x1xf32>
    %cst_86 = arith.constant 8.000000e+00 : f32
    %208 = vector.broadcast %cst_86 : f32 to vector<16x1xf32>
    %209 = arith.divf %207, %208 : vector<16x1xf32>
    %210 = vector.broadcast %202 : vector<16x1xf32> to vector<16x8xf32>
    %211 = arith.subf %196, %210 : vector<16x8xf32>
    %cst_87 = arith.constant 9.99999974E-6 : f32
    %212 = vector.broadcast %cst_87 : f32 to vector<16x1xf32>
    %213 = arith.addf %209, %212 : vector<16x1xf32>
    %214 = math.rsqrt %213 : vector<16x1xf32>
    %215 = vector.broadcast %214 : vector<16x1xf32> to vector<16x8xf32>
    %216 = arith.mulf %211, %215 : vector<16x8xf32>
    %217 = vector.broadcast %197 : vector<1x8xf32> to vector<16x8xf32>
    %218 = arith.mulf %216, %217 : vector<16x8xf32>
    %219 = vector.broadcast %198 : vector<1x8xf32> to vector<16x8xf32>
    %220 = arith.addf %218, %219 : vector<16x8xf32>
    %cst_88 = arith.constant 5.000000e-01 : f32
    %221 = vector.broadcast %cst_88 : f32 to vector<16x8xf32>
    %222 = arith.mulf %221, %220 : vector<16x8xf32>
    %cst_89 = arith.constant 0.707106769 : f32
    %223 = vector.broadcast %cst_89 : f32 to vector<16x8xf32>
    %224 = arith.mulf %220, %223 : vector<16x8xf32>
    %225 = math.erf %224 : vector<16x8xf32>
    %cst_90 = arith.constant 1.000000e+00 : f32
    %226 = vector.broadcast %cst_90 : f32 to vector<16x8xf32>
    %227 = arith.addf %226, %225 : vector<16x8xf32>
    %228 = arith.mulf %222, %227 : vector<16x8xf32>
    %c392 = arith.constant 392 : index
    %c0_91 = arith.constant 0 : index
    %229 = vector.load %arg2[%c392, %c0_91] : memref<424x128xf32, #tpu.memory_space<vmem>>, vector<8x8xf32>
    %cst_92 = arith.constant dense<0.000000e+00> : vector<16x8xf32>
    %230 = tpu.matmul %228, %229, %cst_92 {dimension_numbers = #tpu.dot_dimension_numbers<[1], [0], [0], [1], [0, 0, 1, 1], [], []>} : vector<16x8xf32>, vector<8x8xf32>, vector<16x8xf32> -> vector<16x8xf32>
    %c416 = arith.constant 416 : index
    %c0_93 = arith.constant 0 : index
    %231 = vector.load %arg2[%c416, %c0_93] : memref<424x128xf32, #tpu.memory_space<vmem>>, vector<1x8xf32>
    %232 = vector.broadcast %231 : vector<1x8xf32> to vector<16x8xf32>
    %233 = arith.addf %230, %232 : vector<16x8xf32>
    %cst_94 = arith.constant 5.000000e-01 : f32
    %234 = vector.broadcast %cst_94 : f32 to vector<16x8xf32>
    %235 = arith.mulf %234, %233 : vector<16x8xf32>
    %cst_95 = arith.constant 0.707106769 : f32
    %236 = vector.broadcast %cst_95 : f32 to vector<16x8xf32>
    %237 = arith.mulf %233, %236 : vector<16x8xf32>
    %238 = math.erf %237 : vector<16x8xf32>
    %cst_96 = arith.constant 1.000000e+00 : f32
    %239 = vector.broadcast %cst_96 : f32 to vector<16x8xf32>
    %240 = arith.addf %239, %238 : vector<16x8xf32>
    %241 = arith.mulf %235, %240 : vector<16x8xf32>
    %c417 = arith.constant 417 : index
    %c0_97 = arith.constant 0 : index
    %242 = vector.load %arg2[%c417, %c0_97] : memref<424x128xf32, #tpu.memory_space<vmem>>, vector<1x8xf32>
    %243 = vector.broadcast %242 : vector<1x8xf32> to vector<16x8xf32>
    %244 = arith.mulf %241, %243 : vector<16x8xf32>
    %cst_98 = arith.constant dense<0.000000e+00> : vector<16xf32>
    %245 = vector.multi_reduction <add>, %244, %cst_98 [1] : vector<16x8xf32> to vector<16xf32>
    %246 = vector.shape_cast %245 : vector<16xf32> to vector<16x1xf32>
    %c418 = arith.constant 418 : index
    %c0_99 = arith.constant 0 : index
    %247 = vector.load %arg2[%c418, %c0_99] : memref<424x128xf32, #tpu.memory_space<vmem>>, vector<1x1xf32>
    %248 = vector.broadcast %247 : vector<1x1xf32> to vector<16x1xf32>
    %249 = arith.addf %246, %248 : vector<16x1xf32>
    %250 = arith.negf %249 : vector<16x1xf32>
    %251 = math.exp %250 : vector<16x1xf32>
    %cst_100 = arith.constant 1.000000e+00 : f32
    %252 = vector.broadcast %cst_100 : f32 to vector<16x1xf32>
    %253 = arith.addf %252, %251 : vector<16x1xf32>
    %254 = arith.divf %252, %253 : vector<16x1xf32>
    %255 = vector.broadcast %254 : vector<16x1xf32> to vector<16x32xf32>
    %256 = arith.mulf %255, %128 : vector<16x32xf32>
    %cst_101 = arith.constant 1.000000e+00 : f32
    %257 = vector.broadcast %cst_101 : f32 to vector<16x1xf32>
    %258 = arith.subf %257, %254 : vector<16x1xf32>
    %259 = vector.broadcast %258 : vector<16x1xf32> to vector<16x32xf32>
    %260 = arith.mulf %259, %0 : vector<16x32xf32>
    %261 = arith.addf %256, %260 : vector<16x32xf32>
    %c0_102 = arith.constant 0 : index
    %c0_103 = arith.constant 0 : index
    %262 = vector.load %arg3[%c0_102, %c0_103] : memref<16x32xf32, #tpu.memory_space<vmem>>, vector<16x32xf32>
    tpu.vector_store %arg3[%c0_102, %c0_103], %261 {strides = array<i32>} : memref<16x32xf32, #tpu.memory_space<vmem>>, vector<16x32xf32>,
    return
  }
}

</mosaic_0001>

<bundles_post_ra>
// kernel: tpu_custom_call.1
= control target key start
LH: loop header
LB: loop body
LE: loop exit
PB: predicated region body
PF: predicated region fallthrough
CT: control target
= control target key end

     0   :  { %8 = vsyncpa [#allocation3], 0  ;;  %s2293_s0 = inlined_call_operand.hbm [shape: f32[16,32], index: 0, kind: input, shape index: {}]   ;;  %s2294_s1 = inlined_call_operand.hbm [shape: f32[16,128], index: 1, kind: input, shape index: {}]   ;;  %s2295_s2 = inlined_call_operand.hbm [shape: f32[424,128], index: 2, kind: input, shape index: {}]   ;;  %s2296_s3 = inlined_call_operand.hbm [shape: f32[16,32], index: 3, kind: output, shape index: {}]  }
   0x1   :  { %9 = vsyncpa [#allocation6], 0 }
   0x2   :  { %10 = vsyncpa [#allocation4], 0  ;;  %s2099_s12 = smov [#allocation5]   ;;  %s2100_s14 = smov [#allocation2]  }
   0x3   :  { %s28_s13 = sshll.u32 %s2099_s12, 4  ;;  %s16_s15 = sshll.u32 %s2100_s14, 4  ;;  %s29_s13 = int_to_ptr.vmem [resolvable:$true] %s28_s13  ;;  %s2131_s15 = int_to_ptr.vmem [resolvable:$true] %s16_s15 }
   0x4   :  { %s2005_s18 = scalar_lea.hbm %s2294_s1, 256 }
   0x5   :  { %p2006_p0 = scmp.ne.s32.totalorder %s2294_s1, %s2005_s18  ;;  %p2009_p1 = scmp.lt.u32.totalorder %s2005_s18, %s2294_s1 }
   0x7   :  { %p2011_p2 = pnand %p2009_p1, %p2006_p0 }
   0x9   :  { %2014 = shalt.err (!%p2011_p2)
}
   0xa   :  { %s2015_s23 = scalar_lea.vmem %s29_s13, 256  ;;  %p2020_p4 = scmp.lt.s32.totalorder %s29_s13, %s29_s13 }
   0xb   :  { %p2016_p3 = scmp.ne.s32.totalorder %s29_s13, %s2015_s23  ;;  %p2021_p5 = scmp.lt.s32.totalorder %s2015_s23, %s2015_s23 }
   0xd   :  { %p2022_p6 = por %p2021_p5, %p2020_p4 }
   0xf   :  { %p2023_p7 = pnand %p2022_p6, %p2016_p3 }
  0x11   :  { %2026 = shalt.err (!%p2023_p7)
}
  0x12   :  { %s2101_s24 = smov 128   ;;  %s2102_s25 = smov 8  }
  0x13   :  { %34 = dma.hbm_to_vmem [thread:$0]  %s2294_s1, 256, %s29_s13, [#allocation6], %s2101_s24, %s2101_s24, %s2102_s25  }
  0x14   :  { %s2027_s30 = scalar_lea.hbm %s2293_s0, 256 }
  0x15   :  { %p2028_p8 = scmp.ne.s32.totalorder %s2293_s0, %s2027_s30  ;;  %p2031_p9 = scmp.lt.u32.totalorder %s2027_s30, %s2293_s0 }
  0x17   :  { %p2033_p10 = pnand %p2031_p9, %p2028_p8 }
  0x19   :  { %2036 = shalt.err (!%p2033_p10)
}
  0x1a   :  { %s2037_s8 = scalar_lea.vmem %s2131_s15, 256  ;;  %p2042_p12 = scmp.lt.s32.totalorder %s2131_s15, %s2131_s15 }
  0x1b   :  { %p2038_p11 = scmp.ne.s32.totalorder %s2131_s15, %s2037_s8  ;;  %p2043_p13 = scmp.lt.s32.totalorder %s2037_s8, %s2037_s8 }
  0x1d   :  { %p2044_p0 = por %p2043_p13, %p2042_p12 }
  0x1f   :  { %p2045_p1 = pnand %p2044_p0, %p2038_p11 }
  0x21   :  { %2048 = shalt.err (!%p2045_p1)
}
  0x22   :  { %22 = dma.hbm_to_vmem [thread:$0]  %s2293_s0, 256, %s2131_s15, [#allocation3], %s2101_s24, %s2101_s24, %s2102_s25  }
  0x23   :  { %s2103_s10 = smov [#allocation7]   ;;  %s2049_s14 = scalar_lea.hbm %s2295_s2, 6784 }
  0x24   :  { %s40_s11 = sshll.u32 %s2103_s10, 4  ;;  %p2050_p2 = scmp.ne.s32.totalorder %s2295_s2, %s2049_s14  ;;  %s41_s11 = int_to_ptr.vmem [resolvable:$true] %s40_s11 }
  0x25   :  { %p2053_p3 = scmp.lt.u32.totalorder %s2049_s14, %s2295_s2 }
  0x27   :  { %p2055_p4 = pnand %p2053_p3, %p2050_p2 }
  0x29   :  { %2058 = shalt.err (!%p2055_p4)
}
  0x2a   :  { %s2059_s20 = scalar_lea.vmem %s41_s11, 6784  ;;  %p2064_p6 = scmp.lt.s32.totalorder %s41_s11, %s41_s11 }
  0x2b   :  { %p2060_p5 = scmp.ne.s32.totalorder %s41_s11, %s2059_s20  ;;  %p2065_p7 = scmp.lt.s32.totalorder %s2059_s20, %s2059_s20 }
  0x2d   :  { %p2066_p8 = por %p2065_p7, %p2064_p6 }
  0x2f   :  { %p2067_p9 = pnand %p2066_p8, %p2060_p5 }
  0x31   :  { %2070 = shalt.err (!%p2067_p9)
}
  0x32   :  { %46 = dma.hbm_to_vmem [thread:$0]  %s2295_s2, 6784, %s41_s11, [#allocation6], %s2101_s24, %s2101_s24, %s2102_s25  }
  0x33   :  { %2093 = dma.done.wait [#allocation3], 256  }
  0x34   :  { %2094 = vsyncadd [#allocation3], 4294967040 }
  0x35   :  { %2095 = dma.done.wait [#allocation6], 7040  }
  0x36   :  { %2096 = vsyncadd [#allocation6], 4294960256  ;;  %vm68_vm0 = vcmask 130048   ;;  %v58_v0 = vld [vmem:[#allocation5] sm:$0xff]  ;;  %v59_v1 = vld [vmem:[#allocation5 + $0x8] sm:$0xff]  ;;  %v2104_v7 = vmov 0.0|0.0  }
  0x37   :  { %v60_v2 = vld [vmem:[#allocation7] sm:$0xff]  ;;  %v1844_v3 = vpack.c.bf16 %v59_v1, %v58_v0  ;;  %v61_v4 = vld [vmem:[#allocation7 + $0x8] sm:$0xff]  ;;  %v62_v5 = vld [vmem:[#allocation7 + $0x10] sm:$0xff]  ;;  %1848 = vmatprep.subr.bf16.mxu1 %v2104_v7  ;;  %vm2105_vm1 = vmmov 0   ;;  %v2106_v8 = vmov 0.0   ;;  %vm188_vm2 = vcmask 261120  }
  0x38   :  { %1720 = vmatprep.mubr.msk.f32.mxu0 %vm68_vm0, %v60_v2  ;;  %v63_v6 = vld [vmem:[#allocation7 + $0x18] sm:$0xff]  ;;  %1734 = vmatprep.mubr.msk.f32.mxu1 %vm2105_vm1, %v2106_v8  ;;  %v65_v9 = vld [vmem:[#allocation7 + $0x28] sm:$0xff]  ;;  %v64_v10 = vld [vmem:[#allocation7 + $0x20] sm:$0xff]  ;;  %s2107_s2 = smov 64   ;;  %vm268_vm3 = vcmask 523264   ;;  %s2108_s21 = smov 32  }
  0x39   :  { %1845 = vmatprep.subr.bf16.mxu0 %v1844_v3  ;;  %v67_v15 = vld [vmem:[#allocation7 + $0x38] sm:$0xff]  ;;  %v66_v17 = vld [vmem:[#allocation7 + $0x30] sm:$0xff]  ;;  %v186_v43 = vld [vmem:[#allocation7 + $0x40] sm:$0xff]  ;;  %vm515_vm4 = vcmask 64512   ;;  %s2110_s22 = smov [#allocation8]  }
  0x3a   :  { %1847 = vmatpush3.bf16.msra.mxu0 %v1844_v3  ;;  %v187_v44 = vld [vmem:[#allocation7 + $0x48] sm:$0xff]  ;;  %v308_v61 = vld [vmem:[#allocation7 + $0x50] sm:$0xff]  ;;  %v309_v62 = vld [vmem:[#allocation7 + $0x58] sm:$0xff]  ;;  %s1582_s23 = sshll.u32 %s2110_s22, 4  ;;  %s1583_s23 = int_to_ptr.vmem [resolvable:$true] %s1582_s23 }
  0x3b   :  { %v1854_v63 = vpack.c.bf16 %v309_v62, %v308_v61  ;;  %v310_v0 = vld [vmem:[#allocation7 + $0x60] sm:$0xff]  ;;  %v311_v1 = vld [vmem:[#allocation7 + $0x68] sm:$0xff]  ;;  %v312_v3 = vld [vmem:[#allocation7 + $0x70] sm:$0xff]  ;;  %s2071_s26 = scalar_lea.vmem %s1583_s23, 256  ;;  %p2076_p11 = scmp.lt.s32.totalorder %s1583_s23, %s1583_s23 }
  0x3c   :  { %v1858_v2 = vpack.c.bf16 %v311_v1, %v310_v0  ;;  %v512_v62 = vld [vmem:[#allocation7 + $0xb8] sm:$0xff]  ;;  %v513_v0 = vld [vmem:[#allocation7 + $0xc0] sm:$0xff]  ;;  %vm1898_vm5 = vmpackc.low %vm268_vm3, %vm268_vm3  ;;  %p2072_p10 = scmp.ne.s32.totalorder %s1583_s23, %s2071_s26  ;;  %p2077_p12 = scmp.lt.s32.totalorder %s2071_s26, %s2071_s26 }
  0x3d   :  { %1721 = vmatmul.mubr.msk.f32.vlgmr.msra.gmra.mrb[0].mxu0 %vm68_vm0, %v61_v4  ;;  %1855 = vmatprep.subr.bf16.mxu0 %v1854_v63  ;;  %v313_v4 = vld [vmem:[#allocation7 + $0x78] sm:$0xff]  ;;  %vm2236_vm6 = vmpackc.low %vm188_vm2, %vm188_vm2 }
  0x3e   :  { %1723 = vmatprep.mubr.msk.f32.mxu0 %vm68_vm0, %v62_v5  ;;  %1857 = vmatpush3.bf16.msra.mxu0 %v1854_v63  ;;  %v1862_v5 = vpack.c.bf16 %v313_v4, %v312_v3  ;;  %v514_v63 = vld [vmem:[#allocation7 + $0xc8] sm:$0xff]  ;;  %p2078_p13 = por %p2077_p12, %p2076_p11 }
  0x3f   :  { %1859 = vmatprep.subr.bf16.mxu0 %v1858_v2 }
  0x40   :  { %p2079_p0 = pnand %p2078_p13, %p2072_p10 }
  0x41   :  { %1724 = vmatmul.mubr.msk.f32.gmra.mrb[2].mxu0 %vm68_vm0, %v63_v6  ;;  %v314_v6 = vld [vmem:[#allocation7 + $0x80] sm:$0xff] }
  0x42   :  { %1861 = vmatpush3.bf16.msra.mxu0 %v1858_v2 }
  0x43   :  { %1863 = vmatprep.subr.bf16.mxu0 %v1862_v5 }
  0x46   :  { %1865 = vmatpush3.bf16.msra.mxu0 %v1862_v5 }
 0x110   :  { %v1722_v11 = vpop.f32.mrb[0].mxu0 }
 0x111   :  { %v153_v12 = vadd.f32 %v1722_v11, %v65_v9  ;;  %v147_v13 = vpop.f32.mrb[1].mxu0  ;;  %v315_v9 = vld [vmem:[#allocation7 + $0x88] sm:$0xff] }
 0x112   :  { %v148_v14 = vadd.f32 %v147_v13, %v64_v10  ;;  %v1866_v10 = vpack.c.bf16 %v315_v9, %v314_v6 }
 0x113   :  { %v171_v16 = vmul.f32 0.70710677, %v153_v12  ;;  %v167_v27 = vmul.f32 0.5, %v153_v12 }
 0x114   :  { %v170_v18 = vmul.f32 0.70710677, %v148_v14  ;;  %v1725_v19 = vpop.f32.mrb[2].mxu0  ;;  %v166_v29 = vmul.f32 0.5, %v148_v14  ;;  %1867 = vmatprep.subr.bf16.mxu0 %v1866_v10 }
 0x115   :  { %1941 = verf.f32 %v171_v16  ;;  %v163_v20 = vadd.f32 %v1725_v19, %v67_v15  ;;  %v157_v21 = vpop.f32.mrb[3].mxu0  ;;  %1869 = vmatpush3.bf16.msra.mxu0 %v1866_v10  ;;  %v1600_v15 = vld [vmem:[#allocation7 + $0x190] ss:$0 sm:$0xff] }
 0x116   :  { %1943 = verf.f32 %v170_v18  ;;  %v158_v22 = vadd.f32 %v157_v21, %v66_v17  ;;  %v1601_v17 = vld [vmem:[#allocation7 + $0x191] ss:$0 sm:$0xff] }
 0x117   :  { %v173_v23 = vmul.f32 0.70710677, %v163_v20  ;;  %v169_v35 = vmul.f32 0.5, %v163_v20 }
 0x118   :  { %v172_v24 = vmul.f32 0.70710677, %v158_v22  ;;  %v168_v37 = vmul.f32 0.5, %v158_v22 }
 0x119   :  { %1945 = verf.f32 %v173_v23 }
 0x11a   :  { %1947 = verf.f32 %v172_v24 }
 0x11f   :  { %v1942_v25 = vpop.eup %1941 }
 0x120   :  { %v1944_v26 = vpop.eup %1943  ;;  %v179_v28 = vadd.f32 1.0, %v1942_v25 }
 0x121   :  { %v178_v30 = vadd.f32 1.0, %v1944_v26 }
 0x122   :  { %v183_v31 = vmul.f32 %v179_v28, %v167_v27  ;;  %v412_v27 = vld [vmem:[#allocation7 + $0x90] sm:$0xff]  ;;  %v413_v28 = vld [vmem:[#allocation7 + $0x98] sm:$0xff] }
 0x123   :  { %v1946_v32 = vpop.eup %1945  ;;  %v182_v33 = vmul.f32 %v178_v30, %v166_v29  ;;  %v1870_v29 = vpack.c.bf16 %v413_v28, %v412_v27  ;;  %v414_v30 = vld [vmem:[#allocation7 + $0xa0] sm:$0xff] }
 0x124   :  { %v1948_v34 = vpop.eup %1947  ;;  %v181_v36 = vadd.f32 1.0, %v1946_v32 }
 0x125   :  { %v180_v38 = vadd.f32 1.0, %v1948_v34  ;;  %v1849_v39 = vpack.c.bf16 %v183_v31, %v182_v33  ;;  %v415_v31 = vld [vmem:[#allocation7 + $0xa8] sm:$0xff]  ;;  %v1602_v33 = vld [vmem:[#allocation7 + $0x192] ss:$0 sm:$0xff] }
 0x126   :  { %v185_v40 = vmul.f32 %v181_v36, %v169_v35  ;;  %v1874_v32 = vpack.c.bf16 %v415_v31, %v414_v30 }
 0x127   :  { %v184_v41 = vmul.f32 %v180_v38, %v168_v37  ;;  %1850 = vmatpush3.bf16.msra.mxu1 %v1849_v39 }
 0x128   :  { %1851 = vmatprep.subr.bf16.mxu1 %v2104_v7 }
 0x129   :  { %v1852_v42 = vpack.c.bf16 %v185_v40, %v184_v41 }
 0x12b   :  { %1853 = vmatpush3.bf16.msra.mxu1 %v1852_v42 }
 0x12c   :  { %1871 = vmatprep.subr.bf16.mxu1 %v1870_v29 }
 0x12e   :  { %1735 = vmatmul.mubr.msk.f32.vlgmr.msra.gmra.mrb[0].mxu1 %vm188_vm2, %v186_v43 }
 0x134   :  { %1873 = vmatpush3.bf16.xpose.msra.mxu1 %v1870_v29 }
 0x135   :  { %1875 = vmatprep.subr.bf16.mxu1 %v1874_v32 }
 0x13c   :  { %1877 = vmatpush3.bf16.xpose.msra.mxu1 %v1874_v32 }
 0x201   :  { %v258_v45 = vpop.f32.mrb[0].mxu1 }
 0x202   :  { %v259_v46 = vadd.f32 %v258_v45, %v187_v44  ;;  %v1736_v47 = vpop.f32.mrb[1].mxu1 }
 0x204   :  { %263 = vrot.lane.b32.xlu0 %v259_v46, %s2107_s2  ;;  %v269_v48 = vsel %vm268_vm3, %v259_v46, 0.0 }
 0x223   :  { %270 = vadd.xlane.f32.xlu0 %v269_v48  ;;  %v1605_v48 = vld [vmem:[#allocation7 + $0x193] ss:$0 sm:$0xff] }
 0x276   :  { %v264_v49 = vpop.permute.xlu0 %263 }
 0x277   :  { %v272_v50 = vsel %vm268_vm3, %v264_v49, 0.0 }
 0x278   :  { %273 = vadd.xlane.f32.xlu1 %v272_v50 }
 0x2b0   :  { %v271_v51 = vpop.xlane.xlu0 %270 }
 0x2b1   :  { %v276_v52 = vmul.f32 0.015625, %v271_v51 }
 0x2b3   :  { %v278_v53 = vsub.f32 %v259_v46, %v276_v52 }
 0x2b5   :  { %v280_v54 = vmul.f32 %v278_v53, %v278_v53 }
 0x2b7   :  { %v282_v55 = vsel %vm268_vm3, %v280_v54, 0.0  ;;  %v2206_v54 = vld [vmem:[#allocation2 + $0x8] sm:$0xff] }
 0x2b8   :  { %283 = vadd.xlane.f32.xlu1 %v282_v55 }
 0x305   :  { %v274_v56 = vpop.xlane.xlu1 %273 }
 0x306   :  { %v277_v57 = vmul.f32 0.015625, %v274_v56 }
 0x308   :  { %v279_v58 = vsub.f32 %v264_v49, %v277_v57 }
 0x30a   :  { %v281_v59 = vmul.f32 %v279_v58, %v279_v58 }
 0x30c   :  { %v285_v60 = vsel %vm268_vm3, %v281_v59, 0.0 }
 0x30d   :  { %286 = vadd.xlane.f32.xlu1 %v285_v60 }
 0x345   :  { %v284_v11 = vpop.xlane.xlu1 %283 }
 0x346   :  { %v288_v12 = vmul.f32 0.015625, %v284_v11 }
 0x348   :  { %v290_v13 = vadd.f32 1e-05, %v288_v12 }
 0x34a   :  { %1949 = vrsqrt.f32 %v290_v13 }
 0x354   :  { %v1950_v14 = vpop.eup %1949 }
 0x355   :  { %v294_v16 = vmul.f32 %v1950_v14, %v278_v53  ;;  %v511_v53 = vld [vmem:[#allocation7 + $0xb0] sm:$0xff] }
 0x357   :  { %v300_v18 = vmul.f32 %v1600_v15, %v294_v16 }
 0x359   :  { %v306_v19 = vadd.f32 %v1601_v17, %v300_v18 }
 0x35b   :  { %1753 = vmatprep.mubr.msk.f32.mxu0 %vm268_vm3, %v306_v19 }
 0x39a   :  { %v287_v20 = vpop.xlane.xlu1 %286 }
 0x39b   :  { %v289_v21 = vmul.f32 0.015625, %v287_v20 }
 0x39d   :  { %v291_v22 = vadd.f32 1e-05, %v289_v21 }
 0x39f   :  { %1951 = vrsqrt.f32 %v291_v22 }
 0x3a9   :  { %v1952_v23 = vpop.eup %1951 }
 0x3aa   :  { %v295_v24 = vmul.f32 %v1952_v23, %v279_v58  ;;  %v2211_v58 = vld [vmem:[#allocation2] sm:$0xff] }
 0x3ac   :  { %v301_v25 = vmul.f32 %v1600_v15, %v295_v24 }
 0x3ae   :  { %v307_v26 = vadd.f32 %v1601_v17, %v301_v25  ;;  %v608_v17 = vld [vmem:[#allocation7 + $0xd8] sm:$0xff] }
 0x3b0   :  { %1754 = vmatmul.mubr.msk.f32.vlgmr.msra.gmra.mrb[4].mxu0 %vm268_vm3, %v307_v26 }
 0x3b1   :  { %1769 = vmatprep.mubr.msk.f32.mxu0 %vm515_vm4, %v511_v53 }
 0x483   :  { %v1755_v34 = vpop.f32.mrb[4].mxu0 }
 0x484   :  { %v399_v35 = vadd.f32 %v1755_v34, %v1602_v33  ;;  %v393_v36 = vpop.f32.mrb[5].mxu0  ;;  %v726_v34 = vld [vmem:[#allocation7 + $0xe0] sm:$0xff] }
 0x485   :  { %v394_v37 = vadd.f32 %v1602_v33, %v393_v36 }
 0x486   :  { %v405_v38 = vmul.f32 0.70710677, %v399_v35  ;;  %v403_v45 = vmul.f32 0.5, %v399_v35  ;;  %v727_v35 = vld [vmem:[#allocation7 + $0xe8] sm:$0xff] }
 0x487   :  { %v404_v39 = vmul.f32 0.70710677, %v394_v37  ;;  %v402_v43 = vmul.f32 0.5, %v394_v37  ;;  %v1881_v36 = vpack.c.bf16 %v727_v35, %v726_v34  ;;  %v728_v37 = vld [vmem:[#allocation7 + $0xf0] sm:$0xff] }
 0x488   :  { %1953 = verf.f32 %v405_v38  ;;  %v729_v38 = vld [vmem:[#allocation7 + $0xf8] sm:$0xff] }
 0x489   :  { %1955 = verf.f32 %v404_v39  ;;  %1882 = vmatprep.subr.bf16.mxu1 %v1881_v36  ;;  %v1885_v39 = vpack.c.bf16 %v729_v38, %v728_v37 }
 0x492   :  { %v1954_v40 = vpop.eup %1953 }
 0x493   :  { %v1956_v41 = vpop.eup %1955  ;;  %v409_v42 = vadd.f32 1.0, %v1954_v40  ;;  %v730_v40 = vld [vmem:[#allocation7 + $0x100] sm:$0xff] }
 0x494   :  { %v408_v44 = vadd.f32 1.0, %v1956_v41  ;;  %v731_v41 = vld [vmem:[#allocation7 + $0x108] sm:$0xff] }
 0x495   :  { %v411_v47 = vmul.f32 %v409_v42, %v403_v45  ;;  %v1889_v42 = vpack.c.bf16 %v731_v41, %v730_v40  ;;  %v732_v45 = vld [vmem:[#allocation7 + $0x110] sm:$0xff] }
 0x496   :  { %v410_v46 = vmul.f32 %v408_v44, %v402_v43 }
 0x498   :  { %1764 = vmatprep.mubr.f32.mxu1 %v410_v46  ;;  %v733_v46 = vld [vmem:[#allocation7 + $0x118] sm:$0xff] }
 0x499   :  { %1765 = vmatmul.mubr.f32.vlgmr.msra.gmra.mrb[2].mxu1 %v411_v47  ;;  %v1893_v47 = vpack.c.bf16 %v733_v46, %v732_v45 }
 0x49a   :  { %1884 = vmatpush3.bf16.msra.mxu1 %v1881_v36 }
 0x49b   :  { %1886 = vmatprep.subr.bf16.mxu1 %v1885_v39 }
 0x49e   :  { %1888 = vmatpush3.bf16.msra.mxu1 %v1885_v39 }
 0x49f   :  { %1890 = vmatprep.subr.bf16.mxu1 %v1889_v42 }
 0x4a2   :  { %1892 = vmatpush3.bf16.msra.mxu1 %v1889_v42 }
 0x4a3   :  { %1894 = vmatprep.subr.bf16.mxu1 %v1893_v47 }
 0x4a6   :  { %1896 = vmatpush3.bf16.msra.mxu1 %v1893_v47 }
 0x56c   :  { %v1766_v49 = vpop.f32.mrb[2].mxu1 }
 0x56d   :  { %v2199_v50 = vadd.f32 %v1766_v49, %v1605_v48  ;;  %v487_v51 = vpop.f32.mrb[3].mxu1  ;;  %v934_v49 = vld [vmem:[#allocation7 + $0x140] sm:$0xff] }
 0x56e   :  { %v2202_v52 = vadd.f32 %v1605_v48, %v487_v51  ;;  %v935_v51 = vld [vmem:[#allocation7 + $0x148] sm:$0xff] }
 0x56f   :  { %500 = vrot.lane.b32.xlu1 %v2199_v50, %s2108_s21  ;;  %v1909_v53 = vpack.c.bf16 %v935_v51, %v934_v49  ;;  %v1624_v51 = vld [vmem:[#allocation7 + $0x199] ss:$0 sm:$0xff] }
 0x571   :  { %1910 = vmatprep.subr.bf16.mxu1 %v1909_v53 }
 0x573   :  { %498 = vrot.lane.b32.xlu1 %v2202_v52, %s2108_s21 }
 0x5e1   :  { %v501_v55 = vpop.permute.xlu1 %500 }
 0x5e2   :  { %v505_v56 = vsel %vm188_vm2, %v2206_v54, %v501_v55 }
 0x5e3   :  { %507 = vrot.lane.b32.xlu1 %v505_v56, %s2107_s2  ;;  %v1609_v56 = vld [vmem:[#allocation7 + $0x194] ss:$0 sm:$0xff] }
 0x5e5   :  { %v499_v57 = vpop.permute.xlu1 %498 }
 0x5e6   :  { %v504_v59 = vsel %vm188_vm2, %v2211_v58, %v499_v57 }
 0x655   :  { %v508_v60 = vpop.permute.xlu1 %507 }
 0x656   :  { %v510_v61 = vsel %vm268_vm3, %v504_v59, %v508_v60  ;;  %v1610_v59 = vld [vmem:[#allocation7 + $0x195] ss:$0 sm:$0xff] }
 0x657   :  { %1767 = vmatprep.subr.mxu0 %v510_v61 }
 0x658   :  { %1768 = vmatpush3.msra.mxu0 %v510_v61 }
 0x659   :  { %1770 = vmatmul.mubr.msk.f32.vlgmr.msra.gmra.mrb[6].mxu0 %vm515_vm4, %v512_v62  ;;  %1878 = vmatprep.subr.bf16.mxu0 %v2104_v7 }
 0x65a   :  { %1776 = vmatprep.mubr.msk.f32.mxu0 %vm2105_vm1, %v2106_v8  ;;  %v607_v8 = vld [vmem:[#allocation7 + $0xd0] sm:$0xff] }
 0x72c   :  { %v1771_v1 = vpop.f32.mrb[6].mxu0 }
 0x72d   :  { %v594_v2 = vadd.f32 %v1771_v1, %v514_v63  ;;  %v588_v3 = vpop.f32.mrb[7].mxu0 }
 0x72e   :  { %v589_v4 = vadd.f32 %v588_v3, %v513_v0  ;;  %v936_v3 = vld [vmem:[#allocation7 + $0x150] sm:$0xff] }
 0x72f   :  { %v600_v5 = vmul.f32 0.70710677, %v594_v2  ;;  %v598_v11 = vmul.f32 0.5, %v594_v2 }
 0x730   :  { %v599_v6 = vmul.f32 0.70710677, %v589_v4  ;;  %v597_v13 = vmul.f32 0.5, %v589_v4  ;;  %v937_v4 = vld [vmem:[#allocation7 + $0x158] sm:$0xff] }
 0x731   :  { %1957 = verf.f32 %v600_v5 }
 0x732   :  { %1959 = verf.f32 %v599_v6 }
 0x73b   :  { %v1958_v9 = vpop.eup %1957 }
 0x73c   :  { %v1960_v10 = vpop.eup %1959  ;;  %v604_v12 = vadd.f32 1.0, %v1958_v9  ;;  %v1913_v9 = vpack.c.bf16 %v937_v4, %v936_v3 }
 0x73d   :  { %v603_v14 = vadd.f32 1.0, %v1960_v10  ;;  %v830_v10 = vld [vmem:[#allocation7 + $0x120] sm:$0xff] }
 0x73e   :  { %v606_v7 = vmul.f32 %v604_v12, %v598_v11  ;;  %v831_v11 = vld [vmem:[#allocation7 + $0x128] sm:$0xff] }
 0x73f   :  { %v605_v15 = vmul.f32 %v603_v14, %v597_v13  ;;  %v1897_v12 = vpack.c.bf16 %v831_v11, %v830_v10  ;;  %v832_v13 = vld [vmem:[#allocation7 + $0x130] sm:$0xff]  ;;  %v833_v14 = vld [vmem:[#allocation7 + $0x138] sm:$0xff] }
 0x740   :  { %v1180_v10 = vld [vmem:[#allocation7 + $0x178] sm:$0xff] }
 0x741   :  { %v1879_v16 = vpack.c.bf16 %v606_v7, %v605_v15  ;;  %v1903_v7 = vpack.c.bf16 %v833_v14, %v832_v13  ;;  %v1034_v15 = vld [vmem:[#allocation7 + $0x160] sm:$0xff] }
 0x743   :  { %1880 = vmatpush3.bf16.msra.mxu0 %v1879_v16  ;;  %v1035_v16 = vld [vmem:[#allocation7 + $0x168] sm:$0xff] }
 0x744   :  { %1899 = vmatprep.subr.msk.bf16.mxu0 %vm1898_vm5, %v1897_v12 }
 0x746   :  { %1777 = vmatmul.mubr.msk.f32.vlgmr.msra.gmra.mrb[8].mxu0 %vm68_vm0, %v607_v8  ;;  %v1917_v8 = vpack.c.bf16 %v1035_v16, %v1034_v15 }
 0x74c   :  { %1902 = vmatpush3.bf16.xpose.msk.msra.mxu0 %vm1898_vm5, %v1897_v12 }
 0x74d   :  { %1905 = vmatprep.subr.msk.bf16.mxu0 %vm1898_vm5, %v1903_v7 }
 0x754   :  { %1908 = vmatpush3.bf16.xpose.msk.msra.mxu0 %vm1898_vm5, %v1903_v7 }
 0x755   :  { %1919 = vmatprep.subr.msk.bf16.mxu0 %vm2236_vm6, %v1917_v8 }
 0x819   :  { %v678_v18 = vpop.f32.mrb[8].mxu0 }
 0x81a   :  { %v679_v19 = vadd.f32 %v678_v18, %v608_v17  ;;  %v1778_v20 = vpop.f32.mrb[9].mxu0  ;;  %v1611_v18 = vld [vmem:[#allocation7 + $0x196] ss:$0 sm:$0xff]  ;;  %v1629_v17 = vld [vmem:[#allocation7 + $0x19a] ss:$0 sm:$0xff] }
 0x81c   :  { %683 = vrot.lane.b32.xlu0 %v679_v19, %s2107_s2  ;;  %v688_v21 = vsel %vm268_vm3, %v679_v19, 0.0 }
 0x81d   :  { %689 = vadd.xlane.f32.xlu1 %v688_v21 }
 0x88e   :  { %v684_v22 = vpop.permute.xlu0 %683 }
 0x88f   :  { %v691_v23 = vsel %vm268_vm3, %v684_v22, 0.0 }
 0x890   :  { %692 = vadd.xlane.f32.xlu0 %v691_v23 }
 0x8aa   :  { %v690_v24 = vpop.xlane.xlu1 %689 }
 0x8ab   :  { %v694_v25 = vmul.f32 0.015625, %v690_v24 }
 0x8ad   :  { %v696_v26 = vsub.f32 %v679_v19, %v694_v25  ;;  %v1621_v25 = vld [vmem:[#allocation7 + $0x198] ss:$0 sm:$0xff] }
 0x8af   :  { %v698_v27 = vmul.f32 %v696_v26, %v696_v26 }
 0x8b1   :  { %v700_v28 = vsel %vm268_vm3, %v698_v27, 0.0 }
 0x8b2   :  { %701 = vadd.xlane.f32.xlu1 %v700_v28 }
 0x91d   :  { %v693_v29 = vpop.xlane.xlu0 %692 }
 0x91e   :  { %v695_v30 = vmul.f32 0.015625, %v693_v29 }
 0x920   :  { %v697_v31 = vsub.f32 %v684_v22, %v695_v30 }
 0x922   :  { %v699_v32 = vmul.f32 %v697_v31, %v697_v31 }
 0x924   :  { %v703_v33 = vsel %vm268_vm3, %v699_v32, 0.0 }
 0x925   :  { %704 = vadd.xlane.f32.xlu1 %v703_v33 }
 0x93f   :  { %v702_v43 = vpop.xlane.xlu1 %701 }
 0x940   :  { %v706_v44 = vmul.f32 0.015625, %v702_v43 }
 0x942   :  { %v708_v48 = vadd.f32 1e-05, %v706_v44 }
 0x944   :  { %1961 = vrsqrt.f32 %v708_v48 }
 0x94e   :  { %v1962_v55 = vpop.eup %1961 }
 0x94f   :  { %v712_v57 = vmul.f32 %v1962_v55, %v696_v26 }
 0x951   :  { %v718_v60 = vmul.f32 %v1609_v56, %v712_v57 }
 0x953   :  { %v724_v61 = vadd.f32 %v1610_v59, %v718_v60 }
 0x955   :  { %1795 = vmatprep.mubr.msk.f32.mxu1 %vm268_vm3, %v724_v61 }
 0x9b2   :  { %v705_v62 = vpop.xlane.xlu1 %704 }
 0x9b3   :  { %v707_v63 = vmul.f32 0.015625, %v705_v62 }
 0x9b5   :  { %v709_v0 = vadd.f32 1e-05, %v707_v63 }
 0x9b7   :  { %1963 = vrsqrt.f32 %v709_v0 }
 0x9c1   :  { %v1964_v1 = vpop.eup %1963 }
 0x9c2   :  { %v713_v2 = vmul.f32 %v1964_v1, %v697_v31 }
 0x9c4   :  { %v719_v5 = vmul.f32 %v1609_v56, %v713_v2 }
 0x9c6   :  { %v725_v6 = vadd.f32 %v1610_v59, %v719_v5 }
 0x9c8   :  { %1796 = vmatmul.mubr.msk.f32.vlgmr.msra.gmra.mrb[4].mxu1 %vm268_vm3, %v725_v6 }
 0x9c9   :  { %1912 = vmatpush3.bf16.msra.mxu1 %v1909_v53  ;;  %1817 = vmatprep.mubr.msk.f32.mxu1 %vm188_vm2, %v2211_v58 }
 0x9ca   :  { %1914 = vmatprep.subr.bf16.mxu1 %v1913_v9 }
 0x9cd   :  { %1916 = vmatpush3.bf16.msra.mxu1 %v1913_v9  ;;  %v1179_v9 = vld [vmem:[#allocation7 + $0x170] sm:$0xff] }
 0x9ce   :  { %v1923_v11 = vpack.c.bf16 %v1180_v10, %v1179_v9 }
 0x9d0   :  { %1818 = vmatmul.mubr.msk.f32.vlgmr.msra.gmra.mrb[6].mxu1 %vm188_vm2, %v2206_v54  ;;  %1924 = vmatprep.subr.bf16.mxu1 %v1923_v11 }
 0x9d1   :  { %1926 = vmatpush3.bf16.msra.mxu1 %v1923_v11 }
 0xa9b   :  { %v1797_v19 = vpop.f32.mrb[4].mxu1 }
 0xa9c   :  { %v817_v20 = vadd.f32 %v1797_v19, %v1611_v18  ;;  %v811_v21 = vpop.f32.mrb[5].mxu1  ;;  %v1630_v19 = vld [vmem:[#allocation7 + $0x19b] ss:$0 sm:$0xff] }
 0xa9d   :  { %v812_v22 = vadd.f32 %v1611_v18, %v811_v21 }
 0xa9e   :  { %v823_v23 = vmul.f32 0.70710677, %v817_v20  ;;  %v821_v37 = vmul.f32 0.5, %v817_v20 }
 0xa9f   :  { %v822_v24 = vmul.f32 0.70710677, %v812_v22  ;;  %v820_v35 = vmul.f32 0.5, %v812_v22 }
 0xaa0   :  { %1965 = verf.f32 %v823_v23 }
 0xaa1   :  { %1967 = verf.f32 %v822_v24 }
 0xaa3   :  { %v1819_v26 = vpop.f32.mrb[6].mxu1 }
 0xaa4   :  { %v1021_v27 = vadd.f32 %v1819_v26, %v1621_v25  ;;  %v1015_v28 = vpop.f32.mrb[7].mxu1 }
 0xaa5   :  { %v1016_v29 = vadd.f32 %v1621_v25, %v1015_v28 }
 0xaa6   :  { %v1027_v30 = vmul.f32 0.70710677, %v1021_v27  ;;  %v1025_v45 = vmul.f32 0.5, %v1021_v27 }
 0xaa7   :  { %v1026_v31 = vmul.f32 0.70710677, %v1016_v29  ;;  %v1024_v43 = vmul.f32 0.5, %v1016_v29 }
 0xaa8   :  { %1969 = verf.f32 %v1027_v30 }
 0xaa9   :  { %1971 = verf.f32 %v1026_v31 }
 0xaaa   :  { %v1966_v32 = vpop.eup %1965 }
 0xaab   :  { %v1968_v33 = vpop.eup %1967  ;;  %v827_v34 = vadd.f32 1.0, %v1966_v32 }
 0xaac   :  { %v826_v36 = vadd.f32 1.0, %v1968_v33 }
 0xaad   :  { %v829_v39 = vmul.f32 %v827_v34, %v821_v37  ;;  %v1631_v37 = vld [vmem:[#allocation7 + $0x19c] ss:$0 sm:$0xff] }
 0xaae   :  { %v828_v38 = vmul.f32 %v826_v36, %v820_v35  ;;  %v1277_v36 = vld [vmem:[#allocation7 + $0x180] sm:$0xff] }
 0xab0   :  { %1806 = vmatprep.mubr.msk.f32.mxu0 %vm268_vm3, %v828_v38 }
 0xab1   :  { %1807 = vmatmul.mubr.msk.f32.vlgmr.msra.gmra.mrb[10].mxu0 %vm268_vm3, %v829_v39 }
 0xab2   :  { %v1970_v40 = vpop.eup %1969  ;;  %1922 = vmatpush3.bf16.xpose.msk.msra.mxu0 %vm2236_vm6, %v1917_v8 }
 0xab3   :  { %v1972_v41 = vpop.eup %1971  ;;  %v1031_v42 = vadd.f32 1.0, %v1970_v40  ;;  %1834 = vmatprep.subr.msk.mxu0 %vm68_vm0, %v1277_v36 }
 0xab4   :  { %v1030_v44 = vadd.f32 1.0, %v1972_v41 }
 0xab5   :  { %v1033_v47 = vmul.f32 %v1031_v42, %v1025_v45 }
 0xab6   :  { %v1032_v46 = vmul.f32 %v1030_v44, %v1024_v43 }
 0xab8   :  { %1824 = vmatprep.mubr.msk.f32.mxu0 %vm188_vm2, %v1032_v46 }
 0xab9   :  { %1825 = vmatmul.mubr.msk.f32.vlgmr.msra.gmra.mrb[12].mxu0 %vm188_vm2, %v1033_v47 }
 0xaba   :  { %1835 = vmatpush3.xpose.msk.msra.mxu0 %vm68_vm0, %v1277_v36 }
 0xb84   :  { %v2248_v48 = vpop.f32.mrb[10].mxu0 }
 0xb85   :  { %v2250_v49 = vpop.f32.mrb[11].mxu0 }
 0xb8c   :  { %v1826_v53 = vpop.f32.mrb[12].mxu0 }
 0xb8d   :  { %v1119_v55 = vpop.f32.mrb[13].mxu0  ;;  %v1125_v57 = vadd.f32 %v1826_v53, %v1624_v51 }
 0xb8e   :  { %v1120_v56 = vadd.f32 %v1624_v51, %v1119_v55 }
 0xb8f   :  { %v1133_v60 = vsel %vm68_vm0, %v1125_v57, 0.0 }
 0xb90   :  { %v1130_v59 = vsel %vm68_vm0, %v1120_v56, 0.0 }
 0xb91   :  { %1131 = vadd.xlane.f32.xlu1 %v1130_v59 }
 0xb95   :  { %1134 = vadd.xlane.f32.xlu1 %v1133_v60 }
 0xc1e   :  { %v1132_v61 = vpop.xlane.xlu1 %1131 }
 0xc1f   :  { %v1137_v62 = vmul.f32 0.0625, %v1132_v61 }
 0xc21   :  { %v1139_v63 = vsub.f32 %v1120_v56, %v1137_v62 }
 0xc22   :  { %v1135_v0 = vpop.xlane.xlu1 %1134 }
 0xc23   :  { %v1138_v1 = vmul.f32 0.0625, %v1135_v0  ;;  %v1141_v2 = vmul.f32 %v1139_v63, %v1139_v63 }
 0xc25   :  { %v1140_v3 = vsub.f32 %v1125_v57, %v1138_v1  ;;  %v1143_v4 = vsel %vm68_vm0, %v1141_v2, 0.0  ;;  %v1634_v57 = vld [vmem:[#allocation7 + $0x19d] ss:$0 sm:$0xff] }
 0xc26   :  { %1144 = vadd.xlane.f32.xlu0 %v1143_v4 }
 0xc27   :  { %v1142_v5 = vmul.f32 %v1140_v3, %v1140_v3 }
 0xc29   :  { %v1146_v6 = vsel %vm68_vm0, %v1142_v5, 0.0 }
 0xc2a   :  { %1147 = vadd.xlane.f32.xlu1 %v1146_v6 }
 0xcb3   :  { %v1145_v12 = vpop.xlane.xlu0 %1144 }
 0xcb4   :  { %v1149_v13 = vmul.f32 0.0625, %v1145_v12 }
 0xcb6   :  { %v1151_v14 = vadd.f32 1e-05, %v1149_v13  ;;  %v1418_v13 = vld [vmem:[#allocation7 + $0x188] sm:$0xff] }
 0xcb7   :  { %v1148_v7 = vpop.xlane.xlu1 %1147  ;;  %1839 = vmatprep.subr.mxu1 %v1418_v13 }
 0xcb8   :  { %1973 = vrsqrt.f32 %v1151_v14  ;;  %v1150_v15 = vmul.f32 0.0625, %v1148_v7 }
 0xcba   :  { %v1152_v16 = vadd.f32 1e-05, %v1150_v15 }
 0xcbc   :  { %1975 = vrsqrt.f32 %v1152_v16 }
 0xcc2   :  { %v1974_v8 = vpop.eup %1973 }
 0xcc3   :  { %v1155_v18 = vmul.f32 %v1974_v8, %v1139_v63 }
 0xcc5   :  { %v1161_v20 = vmul.f32 %v1629_v17, %v1155_v18 }
 0xcc6   :  { %v1976_v21 = vpop.eup %1975 }
 0xcc7   :  { %v1156_v22 = vmul.f32 %v1976_v21, %v1140_v3  ;;  %v1167_v23 = vadd.f32 %v1630_v19, %v1161_v20 }
 0xcc9   :  { %v1162_v24 = vmul.f32 %v1629_v17, %v1156_v22  ;;  %v1171_v25 = vmul.f32 0.70710677, %v1167_v23  ;;  %v1169_v29 = vmul.f32 0.5, %v1167_v23  ;;  %v1639_v23 = vld [vmem:[#allocation7 + $0x19f] ss:$0 sm:$0xff] }
 0xccb   :  { %v1168_v26 = vadd.f32 %v1630_v19, %v1162_v24  ;;  %1977 = verf.f32 %v1171_v25  ;;  %v1638_v19 = vld [vmem:[#allocation7 + $0x19e] ss:$0 sm:$0xff] }
 0xccd   :  { %v1172_v27 = vmul.f32 0.70710677, %v1168_v26  ;;  %v1170_v33 = vmul.f32 0.5, %v1168_v26 }
 0xccf   :  { %1979 = verf.f32 %v1172_v27 }
 0xcd5   :  { %v1978_v28 = vpop.eup %1977 }
 0xcd6   :  { %v1175_v30 = vadd.f32 1.0, %v1978_v28 }
 0xcd8   :  { %v1177_v31 = vmul.f32 %v1175_v30, %v1169_v29 }
 0xcd9   :  { %v1980_v32 = vpop.eup %1979 }
 0xcda   :  { %1831 = vmatprep.mubr.msk.f32.mxu1 %vm68_vm0, %v1177_v31  ;;  %v1176_v34 = vadd.f32 1.0, %v1980_v32 }
 0xcdc   :  { %v1178_v35 = vmul.f32 %v1176_v34, %v1170_v33 }
 0xcde   :  { %1832 = vmatmul.mubr.msk.f32.vlgmr.msra.gmra.mrb[8].mxu1 %vm68_vm0, %v1178_v35 }
 0xcdf   :  { %1840 = vmatpush3.msra.mxu1 %v1418_v13 }
 0xdb1   :  { %v1833_v38 = vpop.f32.mrb[8].mxu1 }
 0xdb2   :  { %v1264_v39 = vadd.f32 %v1833_v38, %v1631_v37  ;;  %v1258_v40 = vpop.f32.mrb[9].mxu1  ;;  %v1640_v38 = vld [vmem:[#allocation7 + $0x1a0] ss:$0 sm:$0xff] }
 0xdb3   :  { %v1259_v41 = vadd.f32 %v1631_v37, %v1258_v40 }
 0xdb4   :  { %v1270_v42 = vmul.f32 0.70710677, %v1264_v39  ;;  %v1268_v53 = vmul.f32 0.5, %v1264_v39 }
 0xdb5   :  { %v1269_v43 = vmul.f32 0.70710677, %v1259_v41  ;;  %v1267_v47 = vmul.f32 0.5, %v1259_v41 }
 0xdb6   :  { %1981 = verf.f32 %v1270_v42 }
 0xdb7   :  { %1983 = verf.f32 %v1269_v43 }
 0xdc0   :  { %v1982_v44 = vpop.eup %1981 }
 0xdc1   :  { %v1984_v45 = vpop.eup %1983  ;;  %v1274_v46 = vadd.f32 1.0, %v1982_v44 }
 0xdc2   :  { %v1273_v51 = vadd.f32 1.0, %v1984_v45 }
 0xdc3   :  { %v1276_v56 = vmul.f32 %v1274_v46, %v1268_v53 }
 0xdc4   :  { %v1275_v55 = vmul.f32 %v1273_v51, %v1267_v47 }
 0xdc6   :  { %1836 = vmatprep.mubr.msk.f32.mxu0 %vm68_vm0, %v1275_v55 }
 0xdc7   :  { %1837 = vmatmul.mubr.msk.f32.vlgmr.msra.gmra.mrb[14].mxu0 %vm68_vm0, %v1276_v56  ;;  %v1643_v56 = vld [vmem:[#allocation7 + $0x1a1] ss:$0 sm:$0xff] }
 0xe9a   :  { %v1838_v59 = vpop.f32.mrb[14].mxu0 }
 0xe9b   :  { %v1364_v60 = vadd.f32 %v1838_v59, %v1634_v57  ;;  %v1358_v61 = vpop.f32.mrb[15].mxu0 }
 0xe9c   :  { %v1359_v62 = vadd.f32 %v1634_v57, %v1358_v61 }
 0xe9d   :  { %v1372_v63 = vsel %vm515_vm4, %v1364_v60, 0.0 }
 0xe9e   :  { %1373 = vadd.xlane.f32.xlu1 %v1372_v63  ;;  %v1369_v0 = vsel %vm515_vm4, %v1359_v62, 0.0 }
 0xe9f   :  { %1370 = vadd.xlane.f32.xlu0 %v1369_v0  ;;  %v2109_v0 = vmov 0  }
 0xea0   :  { %1940 = vset.pattern.permute.xlu1 %v2109_v0  ;;  %1939 = vset.pattern.permute.xlu0 %v2109_v0 }
 0xf2b   :  { %v1374_v1 = vpop.xlane.xlu1 %1373 }
 0xf2c   :  { %v1377_v2 = vmul.f32 0.125, %v1374_v1  ;;  %v1371_v3 = vpop.xlane.xlu0 %1370  ;;  %v1644_v1 = vld [vmem:[#allocation7 + $0x1a2] ss:$0 sm:$0xff] }
 0xf2d   :  { %v1376_v4 = vmul.f32 0.125, %v1371_v3 }
 0xf2e   :  { %v1379_v5 = vsub.f32 %v1364_v60, %v1377_v2 }
 0xf2f   :  { %v1378_v6 = vsub.f32 %v1359_v62, %v1376_v4 }
 0xf30   :  { %v1381_v9 = vmul.f32 %v1379_v5, %v1379_v5 }
 0xf31   :  { %v1380_v10 = vmul.f32 %v1378_v6, %v1378_v6 }
 0xf32   :  { %v1385_v11 = vsel %vm515_vm4, %v1381_v9, 0.0 }
 0xf33   :  { %1386 = vadd.xlane.f32.xlu1 %v1385_v11  ;;  %v1382_v12 = vsel %vm515_vm4, %v1380_v10, 0.0 }
 0xf34   :  { %1383 = vadd.xlane.f32.xlu0 %v1382_v12 }
 0xfc0   :  { %v1387_v14 = vpop.xlane.xlu1 %1386 }
 0xfc1   :  { %v1389_v7 = vmul.f32 0.125, %v1387_v14  ;;  %v1384_v15 = vpop.xlane.xlu0 %1383 }
 0xfc2   :  { %v1388_v16 = vmul.f32 0.125, %v1384_v15 }
 0xfc3   :  { %v1391_v8 = vadd.f32 1e-05, %v1389_v7 }
 0xfc4   :  { %v1390_v17 = vadd.f32 1e-05, %v1388_v16 }
 0xfc5   :  { %1985 = vrsqrt.f32 %v1391_v8  ;;  %v1614_v8 = vld [vmem:[#allocation7 + $0x197] ss:$0 sm:$0xff] }
 0xfc6   :  { %1987 = vrsqrt.f32 %v1390_v17  ;;  %v924_v17 = vadd.f32 %v1614_v8, %v2250_v49 }
 0xfcf   :  { %v1986_v18 = vpop.eup %1985 }
 0xfd0   :  { %v1988_v20 = vpop.eup %1987  ;;  %v1395_v21 = vmul.f32 %v1986_v18, %v1379_v5 }
 0xfd1   :  { %v1394_v22 = vmul.f32 %v1988_v20, %v1378_v6  ;;  %v929_v20 = vadd.f32 %v2248_v48, %v1614_v8 }
 0xfd2   :  { %v1401_v24 = vmul.f32 %v1638_v19, %v1395_v21  ;;  %v932_v21 = vadd.f32 %v924_v17, %v2202_v52 }
 0xfd3   :  { %v1400_v25 = vmul.f32 %v1638_v19, %v1394_v22 }
 0xfd4   :  { %v1407_v26 = vadd.f32 %v1639_v23, %v1401_v24 }
 0xfd5   :  { %v1406_v27 = vadd.f32 %v1639_v23, %v1400_v25  ;;  %v933_v25 = vadd.f32 %v929_v20, %v2199_v50 }
 0xfd6   :  { %v1411_v28 = vmul.f32 0.70710677, %v1407_v26  ;;  %v1409_v35 = vmul.f32 0.5, %v1407_v26 }
 0xfd7   :  { %v1410_v29 = vmul.f32 0.70710677, %v1406_v27  ;;  %v1408_v33 = vmul.f32 0.5, %v1406_v27 }
 0xfd8   :  { %1989 = verf.f32 %v1411_v28 }
 0xfd9   :  { %1991 = verf.f32 %v1410_v29 }
 0xfe2   :  { %v1990_v30 = vpop.eup %1989 }
 0xfe3   :  { %v1992_v31 = vpop.eup %1991  ;;  %v1415_v32 = vadd.f32 1.0, %v1990_v30 }
 0xfe4   :  { %v1414_v34 = vadd.f32 1.0, %v1992_v31 }
 0xfe5   :  { %v1417_v37 = vmul.f32 %v1415_v32, %v1409_v35 }
 0xfe6   :  { %v1416_v36 = vmul.f32 %v1414_v34, %v1408_v33 }
 0xfe8   :  { %1841 = vmatprep.mubr.msk.f32.mxu1 %vm515_vm4, %v1416_v36 }
 0xfe9   :  { %1842 = vmatmul.mubr.msk.f32.vlgmr.msra.gmra.mrb[10].mxu1 %vm515_vm4, %v1417_v37 }
0x10bc   :  { %v1843_v39 = vpop.f32.mrb[10].mxu1 }
0x10bd   :  { %v1502_v40 = vadd.f32 %v1843_v39, %v1640_v38  ;;  %v1496_v41 = vpop.f32.mrb[11].mxu1 }
0x10be   :  { %v1497_v42 = vadd.f32 %v1640_v38, %v1496_v41 }
0x10bf   :  { %v1508_v43 = vmul.f32 0.70710677, %v1502_v40  ;;  %v1506_v47 = vmul.f32 0.5, %v1502_v40 }
0x10c0   :  { %v1507_v44 = vmul.f32 0.70710677, %v1497_v42  ;;  %v1505_v53 = vmul.f32 0.5, %v1497_v42 }
0x10c1   :  { %1993 = verf.f32 %v1508_v43 }
0x10c2   :  { %1995 = verf.f32 %v1507_v44 }
0x10cb   :  { %v1994_v45 = vpop.eup %1993 }
0x10cc   :  { %v1996_v46 = vpop.eup %1995  ;;  %v1512_v51 = vadd.f32 1.0, %v1994_v45 }
0x10cd   :  { %v1511_v55 = vadd.f32 1.0, %v1996_v46 }
0x10ce   :  { %v1514_v57 = vmul.f32 %v1512_v51, %v1506_v47 }
0x10cf   :  { %v1513_v59 = vmul.f32 %v1511_v55, %v1505_v53 }
0x10d0   :  { %v1521_v60 = vmul.f32 %v1643_v56, %v1514_v57 }
0x10d1   :  { %v1520_v61 = vmul.f32 %v1643_v56, %v1513_v59 }
0x10d2   :  { %v1525_v62 = vsel %vm515_vm4, %v1521_v60, 0.0 }
0x10d3   :  { %1526 = vadd.xlane.f32.xlu1 %v1525_v62  ;;  %v1522_v63 = vsel %vm515_vm4, %v1520_v61, 0.0 }
0x10d4   :  { %1523 = vadd.xlane.f32.xlu0 %v1522_v63 }
0x1160   :  { %v1527_v2 = vpop.xlane.xlu1 %1526 }
0x1161   :  { %v1534_v3 = vadd.f32 %v1644_v1, %v1527_v2  ;;  %v1524_v4 = vpop.xlane.xlu0 %1523 }
0x1162   :  { %v1533_v5 = vadd.f32 %v1644_v1, %v1524_v4 }
0x1163   :  { %v1646_v6 = vmul.f32 -1.442695, %v1534_v3 }
0x1164   :  { %v1645_v9 = vmul.f32 -1.442695, %v1533_v5 }
0x1165   :  { %1997 = vpow2.f32 %v1646_v6 }
0x1166   :  { %1999 = vpow2.f32 %v1645_v9 }
0x116f   :  { %v1998_v10 = vpop.eup %1997 }
0x1170   :  { %v2000_v11 = vpop.eup %1999  ;;  %v1542_v12 = vadd.f32 1.0, %v1998_v10 }
0x1171   :  { %v1541_v13 = vadd.f32 1.0, %v2000_v11 }
0x1172   :  { %2001 = vrcp.f32 %v1542_v12 }
0x1173   :  { %2003 = vrcp.f32 %v1541_v13 }
0x117c   :  { %v2002_v14 = vpop.eup %2001 }
0x117d   :  { %v2004_v7 = vpop.eup %2003  ;;  %1554 = vperm.xlu1 %1940, %v2002_v14   ;;  %v1560_v16 = vsub.f32 1.0, %v2002_v14 }
0x117e   :  { %1549 = vperm.xlu0 %1939, %v2004_v7   ;;  %v1559_v15 = vsub.f32 1.0, %v2004_v7 }
0x1181   :  { %1563 = vperm.xlu1 %1940, %v1559_v15  }
0x1185   :  { %1568 = vperm.xlu1 %1940, %v1560_v16  }
0x11fc   :  { %v1555_v18 = vpop.permute.xlu1 %1554 }
0x11fd   :  { %v1550_v19 = vpop.permute.xlu0 %1549  ;;  %v1558_v28 = vmul.f32 %v1555_v18, %v933_v25 }
0x11fe   :  { %v1557_v23 = vmul.f32 %v1550_v19, %v932_v21 }
0x1200   :  { %v1564_v22 = vpop.permute.xlu1 %1563 }
0x1201   :  { %v1571_v24 = vmul.f32 %v1564_v22, %v2211_v58 }
0x1203   :  { %v1573_v26 = vadd.f32 %v1571_v24, %v1557_v23 }
0x1204   :  { %v1569_v27 = vpop.permute.xlu1 %1568 }
0x1205   :  { %1575 = vst.msk [vmem:[#allocation8] sm:$0xff] %vm188_vm2, %v1573_v26  ;;  %v1572_v49 = vmul.f32 %v1569_v27, %v2206_v54 }
0x1207   :  { %v1574_v29 = vadd.f32 %v1572_v49, %v1558_v28 }
0x1209   :  { %1576 = vst.msk [vmem:[#allocation8 + $0x8] sm:$0xff] %vm188_vm2, %v1574_v29 }
0x120a   :  { %2082 = shalt.err (!%p2079_p0)
}
0x120b   :  { %s2083_s29 = scalar_lea.hbm %s2296_s3, 256 }
0x120c   :  { %p2084_p1 = scmp.ne.s32.totalorder %s2296_s3, %s2083_s29  ;;  %p2087_p2 = scmp.lt.u32.totalorder %s2083_s29, %s2296_s3 }
0x120e   :  { %p2089_p3 = pnand %p2087_p2, %p2084_p1 }
0x1210   :  { %2092 = shalt.err (!%p2089_p3)
}
0x1211   :  { %1588 = dma.vmem_to_hbm [thread:$0]  %s1583_s23, 256, %s2296_s3, [#allocation4], %s2101_s24, %s2101_s24, %s2102_s25  }
0x1212   :  { %2097 = dma.done.wait [#allocation4], 256  }
0x1213   :  { %2098 = vsyncadd [#allocation4], 4294967040 }
0x1214   :  { %1592 = vsyncpa [#allocation3], 1 }
0x1215   :  { %1593 = vsyncpa [#allocation6], 1 }
0x1216   :  { %1594 = vsyncpa [#allocation4], 1 }

</bundles_post_ra>
